<compile_context>
chip_gen: v6e
topology: v6e:2x2x1
jax: 0.10.0
libtpu: 0.0.40
codegen_flags: <defaults>
</compile_context>

<pallas_src>
import jax
import jax.numpy as jnp
from jax import lax
from jax.experimental import pallas as pl
from jax.experimental.pallas import tpu as pltpu

_NUM_SPLITS = 2      # leading "parallel" grid axis (v7x 2 TCs); harmless on 1-TC chips
_LANE = 128


def _lossb_stats_kernel(x_out_ref, x_ref, w_ref, sx_ref, si_ref):
    """Accumulate per-feature streaming statistics over one batch tile.

    x_out_ref : (tn, F) tile of x_out   (batch on sublanes, features on lanes)
    x_ref     : (tn, F) tile of x
    w_ref     : (1, tn) tile of W^T (f32, batch on lanes)
    sx_ref    : (1, 8, F) f32 partial sums for x_out: row 0 = W^T x_out (= T),
                rows 1..7 = plain column sums (unused).
    si_ref    : (1, 8, F) f32 partial sums for the indicator ij:
                row 0 = W^T ij (= D1), rows 1..7 = sum_b ij (= c1).
    Both outputs are resident across the inner (k) grid axis: init at k == 0,
    accumulate every step (standard accumulator pattern).
    """
    k = pl.program_id(1)

    @pl.when(k == 0)
    def _init():
        sx_ref[...] = jnp.zeros_like(sx_ref)
        si_ref[...] = jnp.zeros_like(si_ref)

    # Cast on load: the HBM copies may be bf16; accumulation stays f32.
    xo = x_out_ref[...].astype(jnp.float32)                         # (tn, F)
    ij = (x_ref[...].astype(jnp.float32) > 0.5).astype(jnp.float32)  # (tn, F)
    w = w_ref[...].astype(jnp.float32)                              # (1, tn)

    # lhs row 0 = W^T, rows 1..7 = ones: a single sublane-aligned (8, tn)
    # operand so each MXU dot yields both the W-weighted and the unweighted
    # column sums.  The n-reduction therefore runs on the MXU; the VPU only
    # does the indicator compare/select, so the narrow (F-wide) lane dim never
    # throttles the hot loop.
    row = lax.broadcasted_iota(jnp.int32, (8, w.shape[1]), 0)
    lhs = jnp.where(row == 0, w, 1.0)                               # (8, tn)

    # HIGHEST precision keeps the f32 accumulation exact; these are two skinny
    # dots whose extra MXU passes sit under the per-tile DMA time.
    sx_ref[...] += jnp.dot(lhs, xo, preferred_element_type=jnp.float32,
                           precision=lax.Precision.HIGHEST)[None]
    si_ref[...] += jnp.dot(lhs, ij, preferred_element_type=jnp.float32,
                           precision=lax.Precision.HIGHEST)[None]


def _choose_tile_rows(n, bytes_per_row):
    """Batch-tile row count: multiple of 128 (lane-aligned W^T tiles), sized so
    the two double-buffered streamed inputs use ~6 MiB (under the 16 MiB v5e
    scoped-VMEM default; v6e/v7x have 32 MiB), capped at 32768 rows."""
    budget = 6 * 1024 * 1024
    tn_cap = (budget // (2 * bytes_per_row)) // _LANE * _LANE
    tn_cap = max(_LANE, min(tn_cap, 32768))
    # Aim for >= 2 tiles per split so the DMA pipeline actually overlaps.
    tn = min(tn_cap, max(_LANE, (n // (2 * _NUM_SPLITS)) // _LANE * _LANE))
    return tn


def _partial_stats_jax(x_out, x, w_col):
    """(T, D1, c1) contributions of a (small) row range, in plain JAX."""
    xo = x_out.astype(jnp.float32)
    ij = (x.astype(jnp.float32) > 0.5).astype(jnp.float32)
    w = w_col.astype(jnp.float32)
    return w @ xo, w @ ij, jnp.sum(ij, axis=0)


@jax.jit
def lossb_forward(x_out, x, W, alpha):
    """Pallas-backed forward of Lossb.  x_out, x: (n, F); W: (n, 1)."""
    x_out = jnp.asarray(x_out)
    x = jnp.asarray(x)
    W = jnp.asarray(W, dtype=jnp.float32)
    n, f = x_out.shape
    assert x.shape == (n, f), (x.shape, x_out.shape)
    assert W.shape == (n, 1), W.shape

    # W is tiny (n*4 bytes): its scalar reductions live in the wrapper so the
    # hot loop carries no SMEM scalar chains.
    sum_w = jnp.sum(W)
    sum_w2 = jnp.sum(W * W)
    w_row = W.reshape(1, n)          # contiguous reshape, no HBM copy

    bytes_per_row = f * (x_out.dtype.itemsize + x.dtype.itemsize) + 4
    tn = _choose_tile_rows(n, bytes_per_row)
    tiles_total = n // tn
    num_splits = min(_NUM_SPLITS, tiles_total)

    if num_splits > 0:
        tps = tiles_total // num_splits          # tiles per split
        n_main = num_splits * tps * tn

        cost = pl.CostEstimate(
            flops=34 * n_main * f,
            transcendentals=0,
            bytes_accessed=n_main * bytes_per_row + num_splits * 2 * 8 * f * 4,
        )

        sx, si = pl.pallas_call(
            _lossb_stats_kernel,
            out_shape=(jax.ShapeDtypeStruct((num_splits, 8, f), jnp.float32),
                       jax.ShapeDtypeStruct((num_splits, 8, f), jnp.float32)),
            grid=(num_splits, tps),
            in_specs=[
                pl.BlockSpec((tn, f), lambda c, k: (c * tps + k, 0)),   # x_out
                pl.BlockSpec((tn, f), lambda c, k: (c * tps + k, 0)),   # x
                pl.BlockSpec((1, tn), lambda c, k: (0, c * tps + k)),   # W^T
            ],
            out_specs=(pl.BlockSpec((1, 8, f), lambda c, k: (c, 0, 0)),
                       pl.BlockSpec((1, 8, f), lambda c, k: (c, 0, 0))),
            compiler_params=pltpu.CompilerParams(
                dimension_semantics=("parallel", "arbitrary"),
                vmem_limit_bytes=32 * 1024 * 1024,
            ),
            cost_estimate=cost,
        )(x_out, x, w_row)

        t = jnp.sum(sx[:, 0, :], axis=0)     # T_f  = sum_a W_a * x_out[a, f]
        d1 = jnp.sum(si[:, 0, :], axis=0)    # D1_f = sum_a W_a * 1[x[a,f] > .5]
        c1 = jnp.sum(si[:, 1, :], axis=0)    # c1_f = #{a : x[a,f] > .5}
    else:
        # n too small to form even one 128-row tile: everything below.
        tps, n_main = 0, 0
        t = jnp.zeros((f,), jnp.float32)
        d1 = jnp.zeros((f,), jnp.float32)
        c1 = jnp.zeros((f,), jnp.float32)

    if n_main < n:
        # Ragged tail (< 2 * num_splits * tn rows): O(r*F) in plain JAX.  This
        # avoids padding/copying the full (n, F) inputs and keeps the hot
        # kernel loop unmasked.
        t_r, d1_r, c1_r = _partial_stats_jax(
            x_out[n_main:], x[n_main:], W[n_main:, 0])
        t, d1, c1 = t + t_r, d1 + d1_r, c1 + c1_r

    # O(F) finalize, off the critical path: exact division (no approx rcp).
    d2 = sum_w - d1
    sum_r2 = c1 / (d1 * d1) + (n - c1) / (d2 * d2)
    t2 = t * t
    s = jnp.sum(t2)
    return jnp.sum((s - t2) * sum_r2) + alpha * sum_w2


def lossb_reference(x_out, x, W, alpha, feature_size):
    """Plain-JAX transliteration of the PyTorch forward (for verification)."""
    loss = jnp.float32(0.0)
    for i in range(feature_size):
        ij = (x[:, i] > 0.5).astype(jnp.float32)            # (n,)
        gx = x_out.T                                        # (F, n)
        gx = gx[jnp.arange(gx.shape[0]) != i]               # (F-1, n)
        wt = W.T                                            # (1, n)
        w_ij = W * ij[None, :]                              # (n, n) broadcast
        w_nij = W * (1.0 - ij)[None, :]                     # (n, n)
        ten1 = (gx @ w_ij) / (wt @ ij)                      # (F-1, n)
        ten2 = (gx @ w_nij) / (wt @ (1.0 - ij))             # (F-1, n)
        loss = loss + jnp.sum((ten1 - ten2) ** 2)
    return loss + alpha * jnp.sum(W ** 2)


if __name__ == "__main__":
    # Make the pure-JAX reference matmuls f32-exact so the comparison is tight.
    jax.config.update("jax_default_matmul_precision", "highest")

    alpha = 0.5
    key = jax.random.PRNGKey(0)
    keys = jax.random.split(key, 4)

    def run_case(n, feature_size, k1, k2):
        x_out = jax.random.normal(k1, (n, feature_size), dtype=jnp.float32)
        x = jax.random.uniform(k2, (n, feature_size), dtype=jnp.float32)
        # Ensure every feature column has samples on both sides of 0.5 (the
        # module's implicit no-divide-by-zero precondition).
        x = x.at[0, :].set(0.9).at[1, :].set(0.1)
        # Deterministic parameter init matching Lossb.__init__:
        # W = cat((1/n)*ones((n-1,1)), 1 - sum(...)) == (1/n)*ones((n,1)).
        W = jnp.full((n, 1), 1.0 / n, dtype=jnp.float32)

        loss = lossb_forward(x_out, x, W, alpha)
        jax.block_until_ready(loss)

        ref = lossb_reference(x_out, x, W, alpha, feature_size)
        assert jnp.isfinite(loss), (n, loss)
        assert jnp.allclose(loss, ref, rtol=5e-3, atol=1e-3), (n, loss, ref)

    # utils.feature_size is taken to be x.shape[1] (the only consistent choice).
    run_case(1024, 16, keys[0], keys[1])   # even split: grid (2, 2), tn = 256
    run_case(777, 16, keys[2], keys[3])    # ragged n: kernel on 768 rows + JAX tail

    # TODO(synk): Lossb.update() mutates module parameter state (not part of
    # the forward pass); not ported.
    print("KERNEL_OK")
</pallas_src>

<mosaic_0001>
module attributes {stable_mosaic.version = 11 : i64} {
  func.func @_lossb_stats_kernel(%arg0: i32, %arg1: i32, %arg2: memref<256x16xf32, #tpu.memory_space<vmem>>, %arg3: memref<256x16xf32, #tpu.memory_space<vmem>>, %arg4: memref<1x256xf32, #tpu.memory_space<vmem>>, %arg5: memref<1x8x16xf32, #tpu.memory_space<vmem>>, %arg6: memref<1x8x16xf32, #tpu.memory_space<vmem>>) attributes {dimension_semantics = [#tpu.dimension_semantics<parallel>, #tpu.dimension_semantics<arbitrary>], iteration_bounds = array<i64: 2, 2>, scalar_prefetch = 0 : i64, scratch_operands = 0 : i64, tpu.core_type = #tpu.core_type<tc>, window_params = [{transform_indices = @transform_0, window_bounds = array<i64: 256, 16>}, {transform_indices = @transform_1, window_bounds = array<i64: 256, 16>}, {transform_indices = @transform_2, window_bounds = array<i64: 1, 256>}, {transform_indices = @transform_3, window_bounds = array<i64: 1, 8, 16>}, {transform_indices = @transform_4, window_bounds = array<i64: 1, 8, 16>}]} {
    %c0_i32 = arith.constant 0 : i32
    %0 = arith.cmpi eq, %arg1, %c0_i32 : i32
    %1 = arith.extui %0 : i1 to i32
    %c0_i32_0 = arith.constant 0 : i32
    %2 = arith.cmpi ne, %1, %c0_i32_0 : i32
    scf.if %2 {
      %cst_22 = arith.constant 0.000000e+00 : f32
      %27 = vector.broadcast %cst_22 : f32 to vector<1x8x16xf32>
      %c0_23 = arith.constant 0 : index
      %c0_24 = arith.constant 0 : index
      %c0_25 = arith.constant 0 : index
      %28 = vector.load %arg5[%c0_23, %c0_24, %c0_25] : memref<1x8x16xf32, #tpu.memory_space<vmem>>, vector<1x8x16xf32>
      tpu.vector_store %arg5[%c0_23, %c0_24, %c0_25], %27 {strides = array<i32>} : memref<1x8x16xf32, #tpu.memory_space<vmem>>, vector<1x8x16xf32>,
      %cst_26 = arith.constant 0.000000e+00 : f32
      %29 = vector.broadcast %cst_26 : f32 to vector<1x8x16xf32>
      %c0_27 = arith.constant 0 : index
      %c0_28 = arith.constant 0 : index
      %c0_29 = arith.constant 0 : index
      %30 = vector.load %arg6[%c0_27, %c0_28, %c0_29] : memref<1x8x16xf32, #tpu.memory_space<vmem>>, vector<1x8x16xf32>
      tpu.vector_store %arg6[%c0_27, %c0_28, %c0_29], %29 {strides = array<i32>} : memref<1x8x16xf32, #tpu.memory_space<vmem>>, vector<1x8x16xf32>,
    } else {
    }
    %c0 = arith.constant 0 : index
    %c0_1 = arith.constant 0 : index
    %3 = vector.load %arg2[%c0, %c0_1] : memref<256x16xf32, #tpu.memory_space<vmem>>, vector<256x16xf32>
    %c0_2 = arith.constant 0 : index
    %c0_3 = arith.constant 0 : index
    %4 = vector.load %arg3[%c0_2, %c0_3] : memref<256x16xf32, #tpu.memory_space<vmem>>, vector<256x16xf32>
    %cst = arith.constant 5.000000e-01 : f32
    %5 = vector.broadcast %cst : f32 to vector<256x16xf32>
    %6 = arith.cmpf ogt, %4, %5 : vector<256x16xf32>
    %7 = arith.extui %6 : vector<256x16xi1> to vector<256x16xi32>
    %8 = arith.sitofp %7 : vector<256x16xi32> to vector<256x16xf32>
    %c0_4 = arith.constant 0 : index
    %c0_5 = arith.constant 0 : index
    %9 = vector.load %arg4[%c0_4, %c0_5] : memref<1x256xf32, #tpu.memory_space<vmem>>, vector<1x256xf32>
    %10 = tpu.iota {dimensions = array<i32: 0>} : vector<8x256xi32>
    %c0_i32_6 = arith.constant 0 : i32
    %11 = vector.broadcast %c0_i32_6 : i32 to vector<8x256xi32>
    %12 = arith.cmpi eq, %10, %11 : vector<8x256xi32>
    %cst_7 = arith.constant 1.000000e+00 : f32
    %13 = vector.shape_cast %9 : vector<1x256xf32> to vector<1x256xf32>
    %14 = vector.broadcast %13 : vector<1x256xf32> to vector<8x256xf32>
    %15 = vector.broadcast %cst_7 : f32 to vector<8x256xf32>
    %16 = arith.select %12, %14, %15 : vector<8x256xi1>, vector<8x256xf32>
    %c0_8 = arith.constant 0 : index
    %c0_9 = arith.constant 0 : index
    %c0_10 = arith.constant 0 : index
    %17 = vector.load %arg5[%c0_8, %c0_9, %c0_10] : memref<1x8x16xf32, #tpu.memory_space<vmem>>, vector<1x8x16xf32>
    %cst_11 = arith.constant dense<0.000000e+00> : vector<8x16xf32>
    %18 = tpu.matmul %16, %3, %cst_11 {dimension_numbers = #tpu.dot_dimension_numbers<[1], [0], [0], [1], [0, 0, 1, 1], [], []>, precision = #tpu.contract_precision<fp32>} : vector<8x256xf32>, vector<256x16xf32>, vector<8x16xf32> -> vector<8x16xf32>
    %19 = vector.shape_cast %18 : vector<8x16xf32> to vector<1x8x16xf32>
    %20 = arith.addf %17, %19 : vector<1x8x16xf32>
    %c0_12 = arith.constant 0 : index
    %c0_13 = arith.constant 0 : index
    %c0_14 = arith.constant 0 : index
    %21 = vector.load %arg5[%c0_12, %c0_13, %c0_14] : memref<1x8x16xf32, #tpu.memory_space<vmem>>, vector<1x8x16xf32>
    tpu.vector_store %arg5[%c0_12, %c0_13, %c0_14], %20 {strides = array<i32>} : memref<1x8x16xf32, #tpu.memory_space<vmem>>, vector<1x8x16xf32>,
    %c0_15 = arith.constant 0 : index
    %c0_16 = arith.constant 0 : index
    %c0_17 = arith.constant 0 : index
    %22 = vector.load %arg6[%c0_15, %c0_16, %c0_17] : memref<1x8x16xf32, #tpu.memory_space<vmem>>, vector<1x8x16xf32>
    %cst_18 = arith.constant dense<0.000000e+00> : vector<8x16xf32>
    %23 = tpu.matmul %16, %8, %cst_18 {dimension_numbers = #tpu.dot_dimension_numbers<[1], [0], [0], [1], [0, 0, 1, 1], [], []>, precision = #tpu.contract_precision<fp32>} : vector<8x256xf32>, vector<256x16xf32>, vector<8x16xf32> -> vector<8x16xf32>
    %24 = vector.shape_cast %23 : vector<8x16xf32> to vector<1x8x16xf32>
    %25 = arith.addf %22, %24 : vector<1x8x16xf32>
    %c0_19 = arith.constant 0 : index
    %c0_20 = arith.constant 0 : index
    %c0_21 = arith.constant 0 : index
    %26 = vector.load %arg6[%c0_19, %c0_20, %c0_21] : memref<1x8x16xf32, #tpu.memory_space<vmem>>, vector<1x8x16xf32>
    tpu.vector_store %arg6[%c0_19, %c0_20, %c0_21], %25 {strides = array<i32>} : memref<1x8x16xf32, #tpu.memory_space<vmem>>, vector<1x8x16xf32>,
    return
  }
  func.func @transform_0(%arg0: i32, %arg1: i32) -> (i32, i32) {
    %c2_i32 = arith.constant 2 : i32
    %0 = arith.muli %arg0, %c2_i32 : i32
    %1 = arith.addi %0, %arg1 : i32
    %c0_i32 = arith.constant 0 : i32
    %c0_i32_0 = arith.constant 0 : i32
    return %1, %c0_i32 : i32, i32
  }
  func.func @transform_1(%arg0: i32, %arg1: i32) -> (i32, i32) {
    %c2_i32 = arith.constant 2 : i32
    %0 = arith.muli %arg0, %c2_i32 : i32
    %1 = arith.addi %0, %arg1 : i32
    %c0_i32 = arith.constant 0 : i32
    %c0_i32_0 = arith.constant 0 : i32
    return %1, %c0_i32 : i32, i32
  }
  func.func @transform_2(%arg0: i32, %arg1: i32) -> (i32, i32) {
    %c2_i32 = arith.constant 2 : i32
    %0 = arith.muli %arg0, %c2_i32 : i32
    %1 = arith.addi %0, %arg1 : i32
    %c0_i32 = arith.constant 0 : i32
    %c0_i32_0 = arith.constant 0 : i32
    return %c0_i32, %1 : i32, i32
  }
  func.func @transform_3(%arg0: i32, %arg1: i32) -> (i32, i32, i32) {
    %c0_i32 = arith.constant 0 : i32
    %c0_i32_0 = arith.constant 0 : i32
    %c0_i32_1 = arith.constant 0 : i32
    return %arg0, %c0_i32, %c0_i32_0 : i32, i32, i32
  }
  func.func @transform_4(%arg0: i32, %arg1: i32) -> (i32, i32, i32) {
    %c0_i32 = arith.constant 0 : i32
    %c0_i32_0 = arith.constant 0 : i32
    %c0_i32_1 = arith.constant 0 : i32
    return %arg0, %c0_i32, %c0_i32_0 : i32, i32, i32
  }
}

</mosaic_0001>

<bundles_post_ra>
// kernel: lossb_forward.1
= control target key start
LH: loop header
LB: loop body
LE: loop exit
PB: predicated region body
PF: predicated region fallthrough
CT: control target
= control target key end

     0   :  { %s3018_s15 = smov 0   ;;  %s3020_s16 = smov 0   ;;  %s4636_s0 = inlined_call_operand.vmem [shape: f32[1024,16], index: 0, kind: input, shape index: {}]   ;;  %s4637_s1 = inlined_call_operand.vmem [shape: f32[1024,16], index: 1, kind: input, shape index: {}]   ;;  %s4638_s2 = inlined_call_operand.vmem [shape: f32[1,1024], index: 2, kind: input, shape index: {}]   ;;  %s4639_s3 = inlined_call_operand.vmem [shape: f32[2,8,16], index: 3, kind: output, shape index: {0}]   ;;  %s4640_s4 = inlined_call_operand.vmem [shape: f32[2,8,16], index: 4, kind: output, shape index: {1}]  }
   0x1   :  { %s3022_s17 = smov 0   ;;  %s3024_s18 = smov 0  }
   0x2   :  { %s3026_s19 = smov 0  }
   0x3 LB: > { %s24_s20 = sadd.s32 1, %s2980_s17  ;;  %s27_s21 = sadd.s32 1, %s2984_s18  ;;  %s2988_s19 = sphi %s3026_s19, %s15_s19   ;;  %s2984_s18 = sphi %s3024_s18, %s5052_s18   ;;  %s2980_s17 = sphi %s3022_s17, %s5051_s17   ;;  %s2976_s16 = sphi %s3020_s16, %s5050_s16   ;;  %s2972_s15 = sphi %s3018_s15, %s5049_s15  }
   0x4   : > { %p25_p0 = scmp.ge.s32.totalorder %s24_s20, 2  ;;  %p2345_p1 = scmp.ge.s32.totalorder %s2988_s19, 1 }
   0x5   : > { %p223_p2 = scmp.lt.s32.totalorder %s2988_s19, 5 }
   0x6   : > { %s5054_s20 = smov (%p25_p0, %s24_s20), 0  ;;  %s5056_s21 = smov (!%p25_p0, %s27_s21), %s2984_s18 }
   0x7   : > { %p224_p3 = pnand %p2345_p1, %p223_p2  ;;  %p29_p4 = scmp.ge.s32.totalorder %s5056_s21, 2 }
   0x9   : > { %s5058_s21 = smov (%p29_p4, %s5056_s21), 0  ;;  %227 = sbr.rel (%p224_p3) target bundleno = 457 (0x1c9), region = 32 }
   0xe   : > { %s2346_s22 = sshll.u32 %s2976_s16, 1  ;;  %p296_p5 = scmp.lt.s32.totalorder %s2976_s16, 1 }
   0xf   : > { %s268_s23 = sadd.s32 %s2972_s15, %s2346_s22  ;;  %p2356_p8 = scmp.ne.s32.totalorder %s2972_s15, 0 }
  0x10   : > { %s2347_s24 = sshll.u32 %s268_s23, 5  ;;  %s2353_s25 = sshll.u32 %s268_s23, 1 }
  0x11   : > { %p270_p6 = scmp.lt.s32.totalorder %s2347_s24, 127  ;;  %p290_p7 = scmp.lt.s32.totalorder %s2353_s25, 7 }
  0x12   : > { %s5060_s16 = smov (!%p296_p5, %s2976_s16), 1 }
  0x13   : > { %s5062_s24 = smov (!%p270_p6, %s2347_s24), 127  ;;  %s5064_s25 = smov (!%p290_p7, %s2353_s25), 7 }
  0x14   : > { %s2348_s26 = sshll.u32 %s5062_s24, 3  ;;  %s2354_s27 = sshll.u32 %s5060_s16, 3 }
  0x15   : > { %s3056_s30 = scalar_lea.vmem %s4636_s0, %s2348_s26  ;;  %s3061_s7 = scalar_lea.vmem %s4637_s1, %s2348_s26 }
  0x16   : > { %s292_s10 = scalar_lea.vmem %s4638_s2, %s5064_s25  ;;  %s3070_s13 = scalar_lea.vmem %s4639_s3, %s2354_s27 }
  0x17   : > { %s3075_s22 = scalar_lea.vmem %s4640_s4, %s2354_s27  ;;  %307 = sbr.rel (%p2356_p8) target bundleno = 30 (0x1e), region = 36 }
  0x1c   : > { %vm308_vm0 = vcmask 130048   ;;  %v2990_v0 = vmov 0.0  }
  0x1d   : > { %309 = vst.msk [vmem:[%s3070_s13] sm:$0xff] %vm308_vm0, %v2990_v0  ;;  %310 = vst.msk [vmem:[%s3075_s22] sm:$0xff] %vm308_vm0, %v2990_v0 }
  0x1e PF: > { %v342_v1 = vld [vmem:[%s3056_s30 + $0xf8] sm:$0xff]  ;;  %v341_v3 = vld [vmem:[%s3056_s30 + $0xf0] sm:$0xff]  ;;  %v340_v8 = vld [vmem:[%s3056_s30 + $0xe8] sm:$0xff] }
  0x1f   : > { %v326_v2 = vld [vmem:[%s3056_s30 + $0x78] sm:$0xff]  ;;  %v3083_v4 = vand.u32 4294901760, %v342_v1  ;;  %v3087_v6 = vand.u32 4294901760, %v341_v3  ;;  %v325_v7 = vld [vmem:[%s3056_s30 + $0x70] sm:$0xff]  ;;  %v324_v9 = vld [vmem:[%s3056_s30 + $0x68] sm:$0xff]  ;;  %v3094_v11 = vand.u32 4294901760, %v340_v8 }
  0x20   : > { %v3085_v5 = vand.u32 4294901760, %v326_v2  ;;  %v3092_v10 = vand.u32 4294901760, %v325_v7  ;;  %v3096_v12 = vand.u32 4294901760, %v324_v9  ;;  %v339_v13 = vld [vmem:[%s3056_s30 + $0xe0] sm:$0xff]  ;;  %v3101_v15 = vld [vmem:[%s3056_s30 + $0xd8] sm:$0xff]  ;;  %v3118_v22 = vld [vmem:[%s3056_s30 + $0xd0] sm:$0xff] }
  0x21   : > { %v323_v14 = vld [vmem:[%s3056_s30 + $0x60] sm:$0xff]  ;;  %2487 = vmatprep.subr.mxu0 %v3083_v4  ;;  %v3104_v17 = vand.u32 4294901760, %v339_v13  ;;  %v3109_v19 = vand.u32 4294901760, %v3101_v15  ;;  %v3112_v20 = vsub.f32 %v342_v1, %v3083_v4  ;;  %v3115_v21 = vld [vmem:[%s3056_s30 + $0x58] sm:$0xff]  ;;  %v3121_v23 = vld [vmem:[%s3056_s30 + $0x50] sm:$0xff]  ;;  %v3131_v26 = vand.u32 4294901760, %v3118_v22 }
  0x22   : > { %v3106_v18 = vand.u32 4294901760, %v323_v14  ;;  %2488 = vmatpush3.msra.mxu0 %v3085_v5  ;;  %v3125_v24 = vand.u32 4294901760, %v3115_v21  ;;  %v3128_v25 = vsub.f32 %v326_v2, %v3085_v5  ;;  %v3134_v27 = vsub.f32 %v341_v3, %v3087_v6  ;;  %v3137_v28 = vld [vmem:[%s3056_s30 + $0xc8] sm:$0xff]  ;;  %v3143_v30 = vld [vmem:[%s3056_s30 + $0xc0] sm:$0xff]  ;;  %v3191_v48 = vld [vmem:[%s3056_s30 + $0xb8] sm:$0xff] }
  0x23   : > { %4800 = vst [vmem:[#allocation2_spill] sm:$0xff] %v3112_v20  ;;  %v3140_v29 = vld [vmem:[%s3056_s30 + $0x48] sm:$0xff]  ;;  %2489 = vmatprep.subr.mxu0 %v3087_v6  ;;  %v4654_v31 = vand.u32 4294901760, %v3112_v20  ;;  %v3148_v32 = vand.u32 4294901760, %v3121_v23  ;;  %v3151_v33 = vsub.f32 %v325_v7, %v3092_v10  ;;  %v3154_v34 = vand.u32 4294901760, %v3137_v28  ;;  %v3166_v39 = vld [vmem:[%s3056_s30 + $0x40] sm:$0xff] }
  0x24   : > { %2490 = vmatpush3.msra.mxu0 %v3092_v10  ;;  %v4652_v35 = vand.u32 4294901760, %v3128_v25  ;;  %v4651_v36 = vand.u32 4294901760, %v3134_v27  ;;  %v3160_v37 = vsub.f32 %v340_v8, %v3094_v11  ;;  %v3163_v38 = vand.u32 4294901760, %v3140_v29  ;;  %v3202_v53 = vld [vmem:[%s3056_s30 + $0x38] sm:$0xff]  ;;  %v3210_v58 = vld [vmem:[%s3056_s30 + $0xb0] sm:$0xff]  ;;  %v3237_v7 = vld [vmem:[%s3056_s30 + $0xa8] sm:$0xff] }
  0x25   : > { %2491 = vmatprep.subr.mxu0 %v3094_v11  ;;  %v717_v40 = vsub.f32 %v3112_v20, %v4654_v31  ;;  %v4648_v41 = vand.u32 4294901760, %v3151_v33  ;;  %v3174_v42 = vsub.f32 %v324_v9, %v3096_v12  ;;  %v3177_v43 = vand.u32 4294901760, %v3143_v30  ;;  %v3223_v63 = vld [vmem:[%s3056_s30 + $0x30] sm:$0xff]  ;;  %v3357_v31 = vld [vmem:[%s3056_s30 + $0x88] sm:$0xff] }
  0x26   : > { %2492 = vmatpush3.msra.mxu0 %v3096_v12  ;;  %v605_v44 = vsub.f32 %v3128_v25, %v4652_v35  ;;  %v724_v45 = vsub.f32 %v3134_v27, %v4651_v36  ;;  %v4647_v46 = vand.u32 4294901760, %v3160_v37  ;;  %v3188_v47 = vsub.f32 %v339_v13, %v3104_v17  ;;  %v3345_v35 = vld [vmem:[%s3056_s30 + $0x10] sm:$0xff] }
  0x27   : > { %4801 = vst [vmem:[#allocation3_spill] sm:$0xff] %v3177_v43  ;;  %2493 = vmatprep.subr.mxu0 %v3104_v17  ;;  %v718_v49 = vand.u32 4294901760, %v717_v40  ;;  %v612_v50 = vsub.f32 %v3151_v33, %v4648_v41  ;;  %v4645_v51 = vand.u32 4294901760, %v3174_v42  ;;  %v3199_v52 = vand.u32 4294901760, %v3166_v39 }
  0x28   : > { %2494 = vmatpush3.msra.mxu0 %v3106_v18  ;;  %v606_v54 = vand.u32 4294901760, %v605_v44  ;;  %v725_v55 = vand.u32 4294901760, %v724_v45  ;;  %v731_v56 = vsub.f32 %v3160_v37, %v4647_v46  ;;  %v4644_v57 = vand.u32 4294901760, %v3188_v47  ;;  %v3320_v46 = vld [vmem:[%s3056_s30 + $0x18] sm:$0xff] }
  0x29   : > { %4802 = vst [vmem:[#allocation4_spill] sm:$0xff] %v3199_v52  ;;  %2495 = vmatprep.subr.mxu0 %v3109_v19  ;;  %2522 = vmatprep.subr.mxu1 %v718_v49  ;;  %v613_v59 = vand.u32 4294901760, %v612_v50  ;;  %v619_v60 = vsub.f32 %v3174_v42, %v4645_v51  ;;  %v3217_v61 = vsub.f32 %v323_v14, %v3106_v18  ;;  %v3220_v62 = vand.u32 4294901760, %v3191_v48 }
  0x2a   : > { %2496 = vmatpush3.msra.mxu0 %v3125_v24  ;;  %2523 = vmatpush3.msra.mxu1 %v606_v54  ;;  %v732_v0 = vand.u32 4294901760, %v731_v56  ;;  %v738_v1 = vsub.f32 %v3188_v47, %v4644_v57  ;;  %v3231_v2 = vsub.f32 %v3101_v15, %v3109_v19  ;;  %v3234_v3 = vand.u32 4294901760, %v3202_v53  ;;  %v3249_v15 = vld [vmem:[%s3056_s30 + $0x28] sm:$0xff]  ;;  %v3308_v57 = vld [vmem:[%s3056_s30 + $0x98] sm:$0xff] }
  0x2b   : > { %4803 = vst [vmem:[#allocation5_spill] sm:$0xff] %v3220_v62  ;;  %2497 = vmatprep.subr.mxu0 %v3131_v26  ;;  %2524 = vmatprep.subr.mxu1 %v725_v55  ;;  %v620_v8 = vand.u32 4294901760, %v619_v60  ;;  %v4642_v9 = vand.u32 4294901760, %v3217_v61  ;;  %v3243_v13 = vsub.f32 %v3115_v21, %v3125_v24  ;;  %v3246_v14 = vand.u32 4294901760, %v3210_v58  ;;  %v3273_v55 = vld [vmem:[%s3056_s30 + $0xa0] sm:$0xff] }
  0x2c   : > { %4804 = vst [vmem:[#allocation6_spill] sm:$0xff] %v3234_v3  ;;  %2498 = vmatpush3.msra.mxu0 %v3148_v32  ;;  %2525 = vmatpush3.msra.mxu1 %v613_v59  ;;  %v739_v40 = vand.u32 4294901760, %v738_v1  ;;  %v4641_v44 = vand.u32 4294901760, %v3231_v2  ;;  %v3255_v45 = vsub.f32 %v3118_v22, %v3131_v26  ;;  %v3258_v49 = vand.u32 4294901760, %v3223_v63 }
  0x2d   : > { %4805 = vst [vmem:[#allocation7_spill] sm:$0xff] %v3246_v14  ;;  %2499 = vmatprep.subr.mxu0 %v3154_v34  ;;  %2526 = vmatprep.subr.mxu1 %v732_v0  ;;  %v626_v21 = vsub.f32 %v3217_v61, %v4642_v9  ;;  %v4643_v50 = vand.u32 4294901760, %v3243_v13  ;;  %v3267_v54 = vsub.f32 %v3121_v23, %v3148_v32  ;;  %v3270_v22 = vand.u32 4294901760, %v3237_v7 }
  0x2e   : > { %4806 = vst [vmem:[#allocation8_spill] sm:$0xff] %v3258_v49  ;;  %2500 = vmatpush3.msra.mxu0 %v3163_v38  ;;  %2527 = vmatpush3.msra.mxu1 %v620_v8  ;;  %v745_v56 = vsub.f32 %v3231_v2, %v4641_v44  ;;  %v4646_v59 = vand.u32 4294901760, %v3255_v45  ;;  %v3282_v60 = vsub.f32 %v3137_v28, %v3154_v34  ;;  %v3285_v23 = vand.u32 4294901760, %v3249_v15  ;;  %v3297_v28 = vld [vmem:[%s3056_s30 + $0x20] sm:$0xff] }
  0x2f   : > { %4807 = vst [vmem:[#allocation9_spill] sm:$0xff] %v3270_v22  ;;  %2501 = vmatprep.subr.mxu0 %v3177_v43  ;;  %2528 = vmatprep.subr.mxu1 %v739_v40  ;;  %v627_v0 = vand.u32 4294901760, %v626_v21  ;;  %v633_v1 = vsub.f32 %v3243_v13, %v4643_v50  ;;  %v4649_v8 = vand.u32 4294901760, %v3267_v54  ;;  %v3294_v44 = vsub.f32 %v3140_v29, %v3163_v38 }
  0x30   : > { %4808 = vst [vmem:[#allocation10_spill] sm:$0xff] %v3285_v23  ;;  %2502 = vmatpush3.msra.mxu0 %v3199_v52  ;;  %v746_v9 = vand.u32 4294901760, %v745_v56  ;;  %v752_v40 = vsub.f32 %v3255_v45, %v4646_v59  ;;  %v4650_v21 = vand.u32 4294901760, %v3282_v60  ;;  %v3305_v50 = vand.u32 4294901760, %v3273_v55 }
  0x31   : > { %2529 = vmatpush3.msra.mxu1 %v627_v0  ;;  %2503 = vmatprep.subr.mxu0 %v3220_v62  ;;  %v634_v29 = vand.u32 4294901760, %v633_v1  ;;  %v640_v56 = vsub.f32 %v3267_v54, %v4649_v8  ;;  %v4653_v51 = vand.u32 4294901760, %v3294_v44  ;;  %v3317_v59 = vsub.f32 %v3143_v30, %v3177_v43  ;;  %v3334_v30 = vld [vmem:[%s3056_s30 + $0x90] sm:$0xff] }
  0x32   : > { %4809 = vst [vmem:[#allocation11_spill] sm:$0xff] %v3305_v50  ;;  %2530 = vmatprep.subr.mxu1 %v746_v9  ;;  %2504 = vmatpush3.msra.mxu0 %v3234_v3  ;;  %v753_v0 = vand.u32 4294901760, %v752_v40  ;;  %v759_v1 = vsub.f32 %v3282_v60, %v4650_v21  ;;  %v3327_v41 = vand.u32 4294901760, %v3297_v28  ;;  %v3331_v8 = vsub.f32 %v3166_v39, %v3199_v52 }
  0x33   : > { %2531 = vmatpush3.msra.mxu1 %v634_v29  ;;  %2505 = vmatprep.subr.mxu0 %v3246_v14  ;;  %v641_v9 = vand.u32 4294901760, %v640_v56  ;;  %v647_v40 = vsub.f32 %v3294_v44, %v4653_v51  ;;  %v4655_v21 = vand.u32 4294901760, %v3317_v59  ;;  %v3342_v36 = vand.u32 4294901760, %v3308_v57 }
  0x34   : > { %4810 = vst [vmem:[#allocation12_spill] sm:$0xff] %v3327_v41  ;;  %2532 = vmatprep.subr.mxu1 %v753_v0  ;;  %2506 = vmatpush3.msra.mxu0 %v3258_v49  ;;  %v760_v39 = vand.u32 4294901760, %v759_v1  ;;  %v4660_v29 = vand.u32 4294901760, %v3331_v8  ;;  %v3351_v56 = vsub.f32 %v3191_v48, %v3220_v62  ;;  %v3354_v51 = vand.u32 4294901760, %v3320_v46 }
  0x35   : > { %4811 = vst [vmem:[#allocation13_spill] sm:$0xff] %v3342_v36  ;;  %2533 = vmatpush3.msra.mxu1 %v641_v9  ;;  %2507 = vmatprep.subr.mxu0 %v3270_v22  ;;  %v648_v16 = vand.u32 4294901760, %v647_v40  ;;  %v766_v0 = vsub.f32 %v3317_v59, %v4655_v21  ;;  %v3365_v1 = vsub.f32 %v3202_v53, %v3234_v3  ;;  %v3368_v48 = vand.u32 4294901760, %v3334_v30  ;;  %v3383_v53 = vld [vmem:[%s3056_s30 + $0x8] sm:$0xff] }
  0x36   : > { %4812 = vst [vmem:[#allocation14_spill] sm:$0xff] %v3354_v51  ;;  %2534 = vmatprep.subr.mxu1 %v760_v39  ;;  %2508 = vmatpush3.msra.mxu0 %v3285_v23  ;;  %v654_v9 = vsub.f32 %v3331_v8, %v4660_v29  ;;  %v3377_v21 = vsub.f32 %v3210_v58, %v3246_v14  ;;  %v3380_v62 = vand.u32 4294901760, %v3345_v35  ;;  %v3392_v40 = vand.u32 4294901760, %v3357_v31  ;;  %v3395_v58 = vld [vmem:[%s3056_s30 + $0x80] sm:$0xff] }
  0x37   : > { %4813 = vst [vmem:[#allocation15_spill] sm:$0xff] %v3365_v1  ;;  %4814 = vst [vmem:[#allocation16_spill] sm:$0xff] %v3368_v48  ;;  %2535 = vmatpush3.msra.mxu1 %v648_v16  ;;  %2509 = vmatprep.subr.mxu0 %v3305_v50  ;;  %v767_v39 = vand.u32 4294901760, %v766_v0  ;;  %v3389_v29 = vsub.f32 %v3223_v63, %v3258_v49  ;;  %v4819_v16 = vand.u32 4294901760, %v3351_v56  ;;  %v4821_v63 = vand.u32 4294901760, %v3365_v1  ;;  %v3419_v0 = vld [vmem:[%s3056_s30] sm:$0xff] }
  0x38   : > { %4815 = vst [vmem:[#allocation17_spill] sm:$0xff] %v3377_v21  ;;  %4816 = vst [vmem:[#allocation18_spill] sm:$0xff] %v3380_v62  ;;  %2510 = vmatpush3.msra.mxu0 %v3327_v41  ;;  %v655_v14 = vand.u32 4294901760, %v654_v9  ;;  %v3404_v3 = vsub.f32 %v3237_v7, %v3270_v22  ;;  %v3412_v9 = vand.u32 4294901760, %v3383_v53  ;;  %v3427_v43 = vand.u32 4294901760, %v3395_v58 }
  0x39   : > { %4817 = vst [vmem:[#allocation19_spill] sm:$0xff] %v3389_v29  ;;  %4818 = vst [vmem:[#allocation20_spill] sm:$0xff] %v3392_v40  ;;  %v773_v52 = vsub.f32 %v3351_v56, %v4819_v16  ;;  %2536 = vmatprep.subr.mxu1 %v767_v39  ;;  %2511 = vmatprep.subr.mxu0 %v3342_v36  ;;  %v661_v49 = vsub.f32 %v3365_v1, %v4821_v63  ;;  %v4822_v39 = vand.u32 4294901760, %v3377_v21 }
  0x3a   : > { %4820 = vst [vmem:[#allocation21_spill] sm:$0xff] %v3404_v3  ;;  %v3416_v16 = vsub.f32 %v3249_v15, %v3285_v23  ;;  %2537 = vmatpush3.msra.mxu1 %v655_v14  ;;  %2512 = vmatpush3.msra.mxu0 %v3354_v51  ;;  %v4681_v63 = vand.u32 4294901760, %v3404_v3  ;;  %v4823_v15 = vand.u32 4294901760, %v3389_v29  ;;  %v3436_v14 = vsub.f32 %v3273_v55, %v3305_v50 }
  0x3b   : > { %v774_v7 = vand.u32 4294901760, %v773_v52  ;;  %v780_v22 = vsub.f32 %v3377_v21, %v4822_v39  ;;  %v662_v1 = vand.u32 4294901760, %v661_v49  ;;  %2513 = vmatprep.subr.mxu0 %v3368_v48  ;;  %v3443_v21 = vand.u32 4294901760, %v3419_v0 }
  0x3c   : > { %v668_v23 = vsub.f32 %v3389_v29, %v4823_v15  ;;  %2514 = vmatpush3.msra.mxu0 %v3380_v62  ;;  %v787_v49 = vsub.f32 %v3404_v3, %v4681_v63  ;;  %v3447_v15 = vsub.f32 %v3297_v28, %v3327_v41  ;;  %v4825_v55 = vand.u32 4294901760, %v3416_v16 }
  0x3d   : > { %2538 = vmatprep.subr.mxu1 %v774_v7  ;;  %v781_v39 = vand.u32 4294901760, %v780_v22  ;;  %4824 = vst [vmem:[#allocation22_spill] sm:$0xff] %v3443_v21  ;;  %2515 = vmatprep.subr.mxu0 %v3392_v40  ;;  %v4686_v7 = vand.u32 4294901760, %v3436_v14  ;;  %v4826_v50 = vlaneseq  ;;  %v3464_v28 = vsub.f32 %v3308_v57, %v3342_v36 }
  0x3e   : > { %2539 = vmatpush3.msra.mxu1 %v662_v1  ;;  %v669_v52 = vand.u32 4294901760, %v668_v23  ;;  %v675_v22 = vsub.f32 %v3416_v16, %v4825_v55  ;;  %v788_v63 = vand.u32 4294901760, %v787_v49  ;;  %2516 = vmatpush3.msra.mxu0 %v3412_v9  ;;  %v4689_v3 = vand.u32 4294901760, %v3447_v15  ;;  %v471_v23 = vld [vmem:[%s292_s10] sm:$0x3] }
  0x3f   : > { %v473_v29 = vshrl.u32 %v4826_v50, 7  ;;  %2540 = vmatprep.subr.mxu1 %v781_v39  ;;  %v3468_v1 = vsub.f32 %v3320_v46, %v3354_v51  ;;  %2517 = vmatprep.subr.mxu0 %v3427_v43  ;;  %v794_v39 = vsub.f32 %v3436_v14, %v4686_v7  ;;  %v4692_v46 = vand.u32 4294901760, %v3464_v28 }
  0x40   : > { %2541 = vmatpush3.msra.mxu1 %v669_v52  ;;  %v676_v50 = vand.u32 4294901760, %v675_v22  ;;  %2518 = vmatpush3.msra.mxu0 %v3443_v21  ;;  %v682_v57 = vsub.f32 %v3447_v15, %v4689_v3  ;;  %v3483_v7 = vsub.f32 %v3334_v30, %v3368_v48 }
  0x41   : > { %vm474_vm1 = vcmp.eq.s32.totalorder %v473_v29, 0  ;;  %v478_v49 = vsub.s32 0, %v473_v29  ;;  %2542 = vmatprep.subr.mxu1 %v788_v63  ;;  %v482_v55 = vsub.s32 1, %v473_v29  ;;  %v4697_v52 = vand.u32 4294901760, %v3468_v1  ;;  %2557 = vmatprep.subr.mxu0 %v3112_v20 }
  0x42   : > { %2543 = vmatpush3.msra.mxu1 %v676_v50  ;;  %v795_v22 = vand.u32 4294901760, %v794_v39  ;;  %v3487_v63 = vsub.f32 %v3345_v35, %v3380_v62  ;;  %v683_v36 = vand.u32 4294901760, %v682_v57  ;;  %v801_v41 = vsub.f32 %v3464_v28, %v4692_v46 }
  0x43   : > { %v479_v51 = vrot.slane %v471_v23, %v478_v49  ;;  %v483_v3 = vrot.slane %v471_v23, %v482_v55  ;;  %v689_v50 = vsub.f32 %v3468_v1, %v4697_v52  ;;  %v4695_v30 = vand.u32 4294901760, %v3483_v7 }
  0x44   : > { %2544 = vmatprep.subr.mxu1 %v795_v22  ;;  %v4694_v49 = vand.u32 4294901760, %v3487_v63  ;;  %v3500_v35 = vsub.f32 %v3357_v31, %v3392_v40  ;;  %v802_v55 = vand.u32 4294901760, %v801_v41  ;;  %v3519_v41 = vsub.f32 %v3383_v53, %v3412_v9 }
  0x45   : > { %v486_v39 = vsel %vm474_vm1, %v479_v51, 1.0  ;;  %2545 = vmatpush3.msra.mxu1 %v683_v36  ;;  %v487_v23 = vsel %vm474_vm1, %v483_v3, 1.0  ;;  %v690_v46 = vand.u32 4294901760, %v689_v50  ;;  %v808_v51 = vsub.f32 %v3483_v7, %v4695_v30 }
  0x46   : > { %v3503_v57 = vand.u32 4294901760, %v486_v39  ;;  %v3505_v20 = vand.u32 4294901760, %v487_v23  ;;  %v696_v22 = vsub.f32 %v3487_v63, %v4694_v49  ;;  %v4696_v31 = vand.u32 4294901760, %v3500_v35  ;;  %2546 = vmatprep.subr.mxu1 %v802_v55 }
  0x47   : > { %v3523_v3 = vsub.f32 %v3395_v58, %v3427_v43  ;;  %v3527_v29 = vsub.f32 %v3419_v0, %v3443_v21  ;;  %2547 = vmatpush3.msra.mxu1 %v690_v46  ;;  %v809_v55 = vand.u32 4294901760, %v808_v51  ;;  %v4706_v58 = vand.u32 4294901760, %v3519_v41 }
  0x48   : > { %4827 = vst [vmem:[#allocation23_spill] sm:$0xff] %v3503_v57  ;;  %4828 = vst [vmem:[#allocation24_spill] sm:$0xff] %v3505_v20  ;;  %v3515_v36 = vsub.f32 %v486_v39, %v3503_v57  ;;  %v3530_v50 = vsub.f32 %v487_v23, %v3505_v20  ;;  %v697_v49 = vand.u32 4294901760, %v696_v22  ;;  %v815_v39 = vsub.f32 %v3500_v35, %v4696_v31 }
  0x49   : > { %826 = vmatprep.mubr.f32.mxu1 %v3505_v20  ;;  %v4705_v0 = vand.u32 4294901760, %v3523_v3  ;;  %v4704_v30 = vand.u32 4294901760, %v3527_v29  ;;  %2548 = vmatprep.subr.mxu1 %v809_v55  ;;  %v703_v22 = vsub.f32 %v3519_v41, %v4706_v58  ;;  %v4846_v58 = vld [vmem:[#allocation10_spill] sm:$0xff] }
  0x4a   : > { %4829 = vst [vmem:[#allocation25_spill] sm:$0xff] %v3515_v36  ;;  %4830 = vst [vmem:[#allocation26_spill] sm:$0xff] %v3530_v50  ;;  %v3537_v53 = vand.u32 4294901760, %v3515_v36  ;;  %v3543_v23 = vand.u32 4294901760, %v3530_v50  ;;  %v816_v46 = vand.u32 4294901760, %v815_v39  ;;  %2549 = vmatpush3.msra.mxu1 %v697_v49 }
  0x4b   : > { %v822_v31 = vsub.f32 %v3523_v3, %v4705_v0  ;;  %v710_v52 = vsub.f32 %v3527_v29, %v4704_v30  ;;  %v704_v20 = vand.u32 4294901760, %v703_v22  ;;  %v4841_v22 = vld [vmem:[#allocation6_spill] sm:$0xff]  ;;  %v4844_v30 = vld [vmem:[#allocation8_spill] sm:$0xff]  ;;  %v4845_v0 = vld [vmem:[#allocation9_spill] sm:$0xff] }
  0x4c   : > { %4831 = vst [vmem:[#allocation27_spill] sm:$0xff] %v3537_v53  ;;  %4832 = vst [vmem:[#allocation28_spill] sm:$0xff] %v3543_v23  ;;  %v594_v51 = vsub.f32 %v3515_v36, %v3537_v53  ;;  %v588_v55 = vsub.f32 %v3530_v50, %v3543_v23  ;;  %2550 = vmatprep.subr.mxu1 %v816_v46  ;;  %v4839_v46 = vld [vmem:[#allocation5_spill] sm:$0xff] }
  0x4d   : > { %v823_v49 = vand.u32 4294901760, %v822_v31  ;;  %v711_v53 = vand.u32 4294901760, %v710_v52  ;;  %2551 = vmatpush3.msra.mxu1 %v704_v20  ;;  %v4835_v20 = vld [vmem:[#allocation3_spill] sm:$0xff]  ;;  %v4837_v31 = vld [vmem:[#allocation4_spill] sm:$0xff] }
  0x4e   : > { %v3558_v39 = vand.u32 4294901760, %v594_v51  ;;  %v3560_v21 = vand.u32 4294901760, %v588_v55  ;;  %v4836_v52 = vld [vmem:[#allocation15_spill] sm:$0xff]  ;;  %v4842_v55 = vld [vmem:[#allocation21_spill] sm:$0xff] }
  0x4f   : > { %2552 = vmatprep.subr.mxu1 %v823_v49  ;;  %v4840_v51 = vld [vmem:[#allocation19_spill] sm:$0xff] }
  0x50   : > { %4833 = vst [vmem:[#allocation29_spill] sm:$0xff] %v3558_v39  ;;  %4834 = vst [vmem:[#allocation30_spill] sm:$0xff] %v3560_v21  ;;  %590 = vmatprep.mubr.f32.mxu0 %v3560_v21  ;;  %2553 = vmatpush3.msra.mxu1 %v711_v53  ;;  %v4838_v53 = vld [vmem:[#allocation17_spill] sm:$0xff]  ;;  %v4843_v49 = vld [vmem:[#allocation7_spill] sm:$0xff] }
  0x51   : > { %596 = vmatmul.mubr.f32.vlgmr.msra.gmra.mxu0 %v3558_v39  ;;  %828 = vmatmul.mubr.f32.vlgmr.msra.gmra.mxu1 %v3503_v57  ;;  %v4847_v39 = vld [vmem:[#allocation11_spill] sm:$0xff]  ;;  %v4848_v21 = vld [vmem:[#allocation12_spill] sm:$0xff]  ;;  %v4849_v57 = vld [vmem:[#allocation13_spill] sm:$0xff] }
  0x52   : > { %2558 = vmatpush3.msra.mxu0 %v3128_v25  ;;  %2592 = vmatprep.subr.mxu1 %v3083_v4 }
  0x53   : > { %2559 = vmatprep.subr.mxu0 %v3134_v27  ;;  %2593 = vmatpush3.msra.mxu1 %v3085_v5 }
  0x54   : > { %2560 = vmatpush3.msra.mxu0 %v3151_v33  ;;  %2594 = vmatprep.subr.mxu1 %v3087_v6 }
  0x55   : > { %2561 = vmatprep.subr.mxu0 %v3160_v37  ;;  %2595 = vmatpush3.msra.mxu1 %v3092_v10 }
  0x56   : > { %2562 = vmatpush3.msra.mxu0 %v3174_v42  ;;  %2596 = vmatprep.subr.mxu1 %v3094_v11 }
  0x57   : > { %2563 = vmatprep.subr.mxu0 %v3188_v47  ;;  %2597 = vmatpush3.msra.mxu1 %v3096_v12 }
  0x58   : > { %2564 = vmatpush3.msra.mxu0 %v3217_v61  ;;  %2598 = vmatprep.subr.mxu1 %v3104_v17 }
  0x59   : > { %2565 = vmatprep.subr.mxu0 %v3231_v2  ;;  %2599 = vmatpush3.msra.mxu1 %v3106_v18 }
  0x5a   : > { %2566 = vmatpush3.msra.mxu0 %v3243_v13  ;;  %2600 = vmatprep.subr.mxu1 %v3109_v19 }
  0x5b   : > { %2567 = vmatprep.subr.mxu0 %v3255_v45  ;;  %2601 = vmatpush3.msra.mxu1 %v3125_v24 }
  0x5c   : > { %2568 = vmatpush3.msra.mxu0 %v3267_v54  ;;  %2602 = vmatprep.subr.mxu1 %v3131_v26 }
  0x5d   : > { %2569 = vmatprep.subr.mxu0 %v3282_v60  ;;  %2603 = vmatpush3.msra.mxu1 %v3148_v32 }
  0x5e   : > { %2570 = vmatpush3.msra.mxu0 %v3294_v44  ;;  %2604 = vmatprep.subr.mxu1 %v3154_v34 }
  0x5f   : > { %2571 = vmatprep.subr.mxu0 %v3317_v59  ;;  %2605 = vmatpush3.msra.mxu1 %v3163_v38 }
  0x60   : > { %2572 = vmatpush3.msra.mxu0 %v3331_v8  ;;  %2606 = vmatprep.subr.mxu1 %v4835_v20 }
  0x61   : > { %2573 = vmatprep.subr.mxu0 %v3351_v56  ;;  %2607 = vmatpush3.msra.mxu1 %v4837_v31 }
  0x62   : > { %2574 = vmatpush3.msra.mxu0 %v4836_v52  ;;  %2608 = vmatprep.subr.mxu1 %v4839_v46 }
  0x63   : > { %2575 = vmatprep.subr.mxu0 %v4838_v53  ;;  %2609 = vmatpush3.msra.mxu1 %v4841_v22 }
  0x64   : > { %2576 = vmatpush3.msra.mxu0 %v4840_v51  ;;  %2610 = vmatprep.subr.mxu1 %v4843_v49 }
  0x65   : > { %2577 = vmatprep.subr.mxu0 %v4842_v55  ;;  %2611 = vmatpush3.msra.mxu1 %v4844_v30 }
  0x66   : > { %2578 = vmatpush3.msra.mxu0 %v3416_v16  ;;  %2612 = vmatprep.subr.mxu1 %v4845_v0  ;;  %v4850_v0 = vld [vmem:[#allocation14_spill] sm:$0xff] }
  0x67   : > { %2579 = vmatprep.subr.mxu0 %v3436_v14  ;;  %2613 = vmatpush3.msra.mxu1 %v4846_v58 }
  0x68   : > { %2580 = vmatpush3.msra.mxu0 %v3447_v15  ;;  %2614 = vmatprep.subr.mxu1 %v4847_v39 }
  0x69   : > { %2581 = vmatprep.subr.mxu0 %v3464_v28  ;;  %963 = vmatprep.mubr.f32.mxu0 %v3530_v50  ;;  %v4851_v50 = vld [vmem:[#allocation2_spill] sm:$0xff] }
  0x6a   : > { %2582 = vmatpush3.msra.mxu0 %v3468_v1  ;;  %2615 = vmatpush3.msra.mxu1 %v4848_v21 }
  0x6b   : > { %2583 = vmatprep.subr.mxu0 %v3483_v7  ;;  %2616 = vmatprep.subr.mxu1 %v4849_v57  ;;  %v4852_v57 = vand.u32 4294901760, %v4851_v50  ;;  %v3721_v50 = vld [vmem:[%s3061_s7 + $0xd8] sm:$0xff] }
  0x6c   : > { %2584 = vmatpush3.msra.mxu0 %v3487_v63  ;;  %2617 = vmatpush3.msra.mxu1 %v4850_v0  ;;  %v4853_v0 = vand.u32 4294901760, %v3128_v25  ;;  %v3642_v25 = vld [vmem:[%s3061_s7 + $0xf8] sm:$0xff]  ;;  %4874 = vst [vmem:[#allocation5_spill] sm:$0xff] %v3721_v50  ;;  %vm4749_vm10 = vcmp.gt.f32.partialorder %v3721_v50, 0.5 }
  0x6d   : > { %2585 = vmatprep.subr.mxu0 %v3500_v35  ;;  %2618 = vmatprep.subr.mxu1 %v3368_v48  ;;  %v4854_v48 = vand.u32 4294901760, %v3134_v27  ;;  %v4859_v27 = vld [vmem:[#allocation27_spill] sm:$0xff]  ;;  %vm4725_vm2 = vcmp.gt.f32.partialorder %v3642_v25, 0.5 }
  0x6e   : > { %2586 = vmatpush3.msra.mxu0 %v3519_v41  ;;  %2619 = vmatpush3.msra.mxu1 %v3380_v62  ;;  %v4855_v62 = vand.u32 4294901760, %v3151_v33  ;;  %v3651_v33 = vld [vmem:[%s3061_s7 + $0x78] sm:$0xff] }
  0x6f   : > { %2587 = vmatprep.subr.mxu0 %v3523_v3  ;;  %2620 = vmatprep.subr.mxu1 %v3392_v40  ;;  %v4856_v40 = vld [vmem:[#allocation22_spill] sm:$0xff]  ;;  %vm4792_vm3 = vcmp.gt.f32.partialorder %v3651_v33, 0.5 }
  0x70   : > { %2588 = vmatpush3.msra.mxu0 %v3527_v29  ;;  %2621 = vmatpush3.msra.mxu1 %v3412_v9 }
  0x71   : > { %966 = vmatmul.mubr.f32.vlgmr.msra.gmra.mxu0 %v3515_v36  ;;  %2627 = vmatprep.subr.mxu0 %v4852_v57  ;;  %v4857_v36 = vand.u32 4294901760, %v3160_v37  ;;  %v4858_v57 = vand.u32 4294901760, %v3174_v42  ;;  %v4861_v37 = vand.u32 4294901760, %v3217_v61  ;;  %v4862_v42 = vand.u32 4294901760, %v3231_v2 }
  0x72   : > { %2628 = vmatpush3.msra.mxu0 %v4853_v0  ;;  %2622 = vmatprep.subr.mxu1 %v3427_v43  ;;  %v4731_v61 = vmov 0.0   ;;  %v4865_v2 = vand.u32 4294901760, %v3267_v54  ;;  %v4875_v0 = vand.u32 4294901760, %v3351_v56 }
  0x73   : > { %2629 = vmatprep.subr.mxu0 %v4854_v48  ;;  %2623 = vmatpush3.msra.mxu1 %v4856_v40  ;;  %v4860_v48 = vand.u32 4294901760, %v3188_v47  ;;  %v4863_v47 = vand.u32 4294901760, %v3243_v13  ;;  %v4867_v13 = vand.u32 4294901760, %v3282_v60 }
  0x74   : > { %2630 = vmatpush3.msra.mxu0 %v4855_v62  ;;  %1070 = vmatprep.mubr.f32.mxu1 %v3543_v23  ;;  %v3661_v62 = vld [vmem:[%s3061_s7 + $0xf0] sm:$0xff] }
  0x75   : > { %2631 = vmatprep.subr.mxu0 %v4857_v36  ;;  %1074 = vmatmul.mubr.f32.vlgmr.msra.gmra.mxu1 %v4859_v27  ;;  %vm4728_vm4 = vcmp.gt.f32.partialorder %v3661_v62, 0.5  ;;  %v3706_v36 = vld [vmem:[%s3061_s7 + $0xe0] sm:$0xff] }
  0x76   : > { %2632 = vmatpush3.msra.mxu0 %v4858_v57  ;;  %2662 = vmatprep.subr.mxu1 %v3083_v4  ;;  %v3668_v4 = vld [vmem:[%s3061_s7 + $0x70] sm:$0xff]  ;;  %v2387_v60 = vsel %vm4728_vm4, 1.0, %v4731_v61  ;;  %4871 = vst [vmem:[#allocation4_spill] sm:$0xff] %v3706_v36  ;;  %vm4741_vm8 = vcmp.gt.f32.partialorder %v3706_v36, 0.5  ;;  %v4029_v36 = vld [vmem:[%s3061_s7 + $0x18] sm:$0xff] }
  0x77   : > { %2633 = vmatprep.subr.mxu0 %v4860_v48  ;;  %2663 = vmatpush3.msra.mxu1 %v3085_v5  ;;  %v4864_v5 = vand.u32 4294901760, %v3255_v45  ;;  %vm4742_vm5 = vcmp.gt.f32.partialorder %v3668_v4, 0.5  ;;  %v3691_v45 = vld [vmem:[%s3061_s7 + $0x68] sm:$0xff]  ;;  %v3732_v57 = vsub.f32 %v2387_v60, %v2387_v60 }
  0x78   : > { %2634 = vmatpush3.msra.mxu0 %v4861_v37  ;;  %2664 = vmatprep.subr.mxu1 %v3087_v6  ;;  %v2388_v6 = vsel %vm4725_vm2, 1.0, %v4731_v61  ;;  %4868 = vst [vmem:[#allocation15_spill] sm:$0xff] %v3691_v45  ;;  %vm4733_vm7 = vcmp.gt.f32.partialorder %v3691_v45, 0.5  ;;  %v4879_v37 = vand.u32 4294901760, %v4840_v51  ;;  %v2385_v51 = vsel %vm4741_vm8, 1.0, %v4731_v61  ;;  %v3807_v60 = vld [vmem:[%s3061_s7 + $0x48] sm:$0xff] }
  0x79   : > { %2635 = vmatprep.subr.mxu0 %v4862_v42  ;;  %2665 = vmatpush3.msra.mxu1 %v3092_v10  ;;  %v3681_v10 = vld [vmem:[%s3061_s7 + $0xe8] sm:$0xff]  ;;  %v3696_v54 = vsub.f32 %v2388_v6, %v2388_v6  ;;  %v4881_v42 = vand.u32 4294901760, %v4842_v55  ;;  %4887 = vst [vmem:[#allocation8_spill] sm:$0xff] %v3807_v60  ;;  %vm4718_vm15 = vcmp.gt.f32.partialorder %v3807_v60, 0.5  ;;  %v4915_v45 = vmov 1.0  }
  0x7a   : > { %2636 = vmatpush3.msra.mxu0 %v4863_v47  ;;  %2666 = vmatprep.subr.mxu1 %v3094_v11  ;;  %4866 = vst [vmem:[#allocation3_spill] sm:$0xff] %v3681_v10  ;;  %v2372_v11 = vsel %vm4792_vm3, 1.0, %v4731_v61  ;;  %vm4734_vm6 = vcmp.gt.f32.partialorder %v3681_v10, 0.5 }
  0x7b   : > { %2637 = vmatprep.subr.mxu0 %v4864_v5  ;;  %2667 = vmatpush3.msra.mxu1 %v3096_v12  ;;  %v4869_v12 = vand.u32 4294901760, %v3294_v44  ;;  %v4872_v44 = vand.u32 4294901760, %v3331_v8  ;;  %v3727_v8 = vld [vmem:[%s3061_s7 + $0x58] sm:$0xff]  ;;  %v2386_v48 = vsel %vm4734_vm6, 1.0, %v4731_v61  ;;  %v4724_v56 = vand.u32 4294901760, %v3696_v54 }
  0x7c   : > { %2638 = vmatpush3.msra.mxu0 %v4865_v2  ;;  %2668 = vmatprep.subr.mxu1 %v3104_v17  ;;  %v4870_v17 = vand.u32 4294901760, %v3317_v59  ;;  %v2371_v59 = vsel %vm4742_vm5, 1.0, %v4731_v61  ;;  %4876 = vst [vmem:[#allocation19_spill] sm:$0xff] %v3727_v8  ;;  %vm386_vm11 = vcmp.gt.f32.partialorder %v3727_v8, 0.5  ;;  %v3760_v47 = vsub.f32 %v2386_v48, %v2386_v48 }
  0x7d   : > { %2639 = vmatprep.subr.mxu0 %v4867_v13  ;;  %2669 = vmatpush3.msra.mxu1 %v3106_v18  ;;  %v3711_v18 = vsub.f32 %v2372_v11, %v2372_v11  ;;  %v3779_v6 = vsub.f32 %v3696_v54, %v4724_v56  ;;  %v2368_v2 = vsel %vm386_vm11, 1.0, %v4731_v61  ;;  %v4722_v13 = vand.u32 4294901760, %v3732_v57 }
  0x7e   : > { %2640 = vmatpush3.msra.mxu0 %v4869_v12  ;;  %2670 = vmatprep.subr.mxu1 %v3109_v19  ;;  %v3718_v19 = vld [vmem:[%s3061_s7 + $0x60] sm:$0xff]  ;;  %v3794_v12 = vld [vmem:[%s3061_s7 + $0xc8] sm:$0xff] }
  0x7f   : > { %2641 = vmatprep.subr.mxu0 %v4870_v17  ;;  %2671 = vmatpush3.msra.mxu1 %v3125_v24  ;;  %4873 = vst [vmem:[#allocation17_spill] sm:$0xff] %v3718_v19  ;;  %v4877_v24 = vand.u32 4294901760, %v4836_v52  ;;  %v3742_v52 = vsub.f32 %v2371_v59, %v2371_v59  ;;  %vm4750_vm9 = vcmp.gt.f32.partialorder %v3718_v19, 0.5  ;;  %4885 = vst [vmem:[#allocation7_spill] sm:$0xff] %v3794_v12  ;;  %v4886_v17 = vand.u32 4294901760, %v3447_v15 }
  0x80   : > { %2642 = vmatpush3.msra.mxu0 %v4872_v44  ;;  %2672 = vmatprep.subr.mxu1 %v3131_v26  ;;  %v4878_v26 = vand.u32 4294901760, %v4838_v53  ;;  %v3755_v53 = vld [vmem:[%s3061_s7 + $0xd0] sm:$0xff]  ;;  %v2369_v55 = vsel %vm4750_vm9, 1.0, %v4731_v61  ;;  %v4888_v44 = vand.u32 4294901760, %v3464_v28  ;;  %v3824_v28 = vsub.f32 %v2368_v2, %v2368_v2 }
  0x81   : > { %2643 = vmatprep.subr.mxu0 %v4875_v0  ;;  %2673 = vmatpush3.msra.mxu1 %v3148_v32  ;;  %v2370_v32 = vsel %vm4733_vm7, 1.0, %v4731_v61  ;;  %4880 = vst [vmem:[#allocation6_spill] sm:$0xff] %v3755_v53  ;;  %vm4761_vm12 = vcmp.gt.f32.partialorder %v3755_v53, 0.5  ;;  %v4720_v11 = vand.u32 4294901760, %v3742_v52  ;;  %v3812_v59 = vsub.f32 %v2369_v55, %v2369_v55  ;;  %v3819_v0 = vld [vmem:[%s3061_s7 + $0xc0] sm:$0xff] }
  0x82   : > { %2644 = vmatpush3.msra.mxu0 %v4877_v24  ;;  %2674 = vmatprep.subr.mxu1 %v3154_v34  ;;  %v4723_v34 = vand.u32 4294901760, %v3711_v18  ;;  %v3768_v5 = vsub.f32 %v2370_v32, %v2370_v32  ;;  %4889 = vst [vmem:[#allocation10_spill] sm:$0xff] %v3819_v0  ;;  %v4890_v24 = vand.u32 4294901760, %v3468_v1  ;;  %vm4719_vm14 = vcmp.gt.f32.partialorder %v3794_v12, 0.5  ;;  %v4892_v32 = vld [vmem:[#allocation9_spill] sm:$0xff]  ;;  %v4911_v1 = vld [vmem:[#allocation20_spill] sm:$0xff] }
  0x83   : > { %2645 = vmatprep.subr.mxu0 %v4878_v26  ;;  %2675 = vmatpush3.msra.mxu1 %v3163_v38  ;;  %v4882_v38 = vand.u32 4294901760, %v3416_v16  ;;  %v3782_v16 = vld [vmem:[%s3061_s7 + $0x50] sm:$0xff]  ;;  %v4891_v26 = vand.u32 4294901760, %v3483_v7  ;;  %v3847_v7 = vld [vmem:[%s3061_s7 + $0x40] sm:$0xff]  ;;  %vm4771_vm0 = vcmp.gt.f32.partialorder %v3819_v0, 0.5  ;;  %v4726_v2 = vand.u32 4294901760, %v3812_v59 }
  0x84   : > { %2646 = vmatpush3.msra.mxu0 %v4879_v37  ;;  %2676 = vmatprep.subr.mxu1 %v4835_v20  ;;  %v2384_v20 = vsel %vm4749_vm10, 1.0, %v4731_v61  ;;  %4883 = vst [vmem:[#allocation21_spill] sm:$0xff] %v3782_v16  ;;  %vm4766_vm13 = vcmp.gt.f32.partialorder %v3782_v16, 0.5  ;;  %v4716_v48 = vand.u32 4294901760, %v3768_v5  ;;  %v3843_v37 = vsub.f32 %v3742_v52, %v4720_v11 }
  0x85   : > { %2647 = vmatprep.subr.mxu0 %v4881_v42  ;;  %2677 = vmatpush3.msra.mxu1 %v4837_v31  ;;  %v4884_v31 = vand.u32 4294901760, %v3436_v14  ;;  %v3799_v14 = vsub.f32 %v2385_v51, %v2385_v51  ;;  %v3814_v15 = vsub.f32 %v2384_v20, %v2384_v20  ;;  %v4893_v42 = vand.u32 4294901760, %v3487_v63  ;;  %v3973_v51 = vld [vmem:[%s3061_s7 + $0xa8] sm:$0xff] }
  0x86   : > { %2648 = vmatpush3.msra.mxu0 %v4882_v38  ;;  %2678 = vmatprep.subr.mxu1 %v4839_v46  ;;  %v3804_v46 = vsub.f32 %v3711_v18, %v4723_v34  ;;  %v2367_v38 = vsel %vm4766_vm13, 1.0, %v4731_v61  ;;  %v4894_v20 = vand.u32 4294901760, %v3500_v35  ;;  %v2382_v63 = vsel %vm4719_vm14, 1.0, %v4731_v61  ;;  %v3876_v35 = vld [vmem:[%s3061_s7 + $0x38] sm:$0xff]  ;;  %v4905_v34 = vld [vmem:[#allocation14_spill] sm:$0xff] }
  0x87   : > { %2649 = vmatprep.subr.mxu0 %v4884_v31  ;;  %2679 = vmatpush3.msra.mxu1 %v4841_v22  ;;  %v4717_v22 = vand.u32 4294901760, %v3760_v47  ;;  %v4721_v55 = vand.u32 4294901760, %v3799_v14  ;;  %vm4772_vm1 = vcmp.gt.f32.partialorder %v3847_v7, 0.5  ;;  %vm4774_vm14 = vcmp.gt.f32.partialorder %v3876_v35, 0.5 }
  0x88   : > { %2650 = vmatpush3.msra.mxu0 %v4886_v17  ;;  %2680 = vmatprep.subr.mxu1 %v4843_v49  ;;  %v2383_v49 = vsel %vm4761_vm12, 1.0, %v4731_v61  ;;  %v3873_v17 = vld [vmem:[%s3061_s7 + $0xb8] sm:$0xff]  ;;  %v4735_v11 = vmov 1.0  }
  0x89   : > { %2651 = vmatprep.subr.mxu0 %v4888_v44  ;;  %2681 = vmatpush3.msra.mxu1 %v4844_v30  ;;  %v3838_v30 = vsub.f32 %v3732_v57, %v4722_v13  ;;  %v3861_v31 = vsub.f32 %v2383_v49, %v2383_v49  ;;  %v4896_v44 = vld [vmem:[#allocation24_spill] sm:$0xff]  ;;  %v3887_v49 = vsub.f32 %v3768_v5, %v4716_v48 }
  0x8a   : > { %2652 = vmatpush3.msra.mxu0 %v4890_v24  ;;  %2682 = vmatprep.subr.mxu1 %v4892_v32  ;;  %v2366_v24 = vsel %vm4718_vm15, 1.0, %v4731_v61  ;;  %v4897_v32 = vand.u32 4294901760, %v3523_v3  ;;  %v3902_v48 = vld [vmem:[%s3061_s7 + $0xb0] sm:$0xff]  ;;  %v4900_v3 = vld [vmem:[#allocation13_spill] sm:$0xff]  ;;  %vm4773_vm15 = vcmp.gt.f32.partialorder %v3873_v17, 0.5 }
  0x8b   : > { %2653 = vmatprep.subr.mxu0 %v4891_v26  ;;  %2683 = vmatpush3.msra.mxu1 %v4846_v58  ;;  %v3869_v58 = vsub.f32 %v3760_v47, %v4717_v22  ;;  %v4727_v26 = vand.u32 4294901760, %v3814_v15  ;;  %4898 = vst [vmem:[#allocation11_spill] sm:$0xff] %v3902_v48  ;;  %v4899_v22 = vand.u32 4294901760, %v3527_v29  ;;  %v3919_v29 = vsub.f32 %v2382_v63, %v2382_v63  ;;  %v3932_v13 = vld [vmem:[%s3061_s7 + $0x30] sm:$0xff] }
  0x8c   : > { %2654 = vmatpush3.msra.mxu0 %v4893_v42  ;;  %2684 = vmatprep.subr.mxu1 %v4847_v39  ;;  %v4895_v39 = vand.u32 4294901760, %v3519_v41  ;;  %v3895_v42 = vsub.f32 %v2367_v38, %v2367_v38  ;;  %v4729_v38 = vand.u32 4294901760, %v3824_v28  ;;  %4904 = vst [vmem:[#allocation22_spill] sm:$0xff] %v3932_v13  ;;  %v2364_v63 = vsel %vm4774_vm14, 1.0, %v4731_v61  ;;  %4909 = vst [vmem:[#allocation13_spill] sm:$0xff] %v3973_v51 }
  0x8d   : > { %2655 = vmatprep.subr.mxu0 %v4894_v20  ;;  %1240 = vmatprep.mubr.f32.mxu0 %v4896_v44  ;;  %4902 = vst [vmem:[#allocation12_spill] sm:$0xff] %v3919_v29  ;;  %v3943_v56 = vsub.f32 %v3814_v15, %v4727_v26  ;;  %v4908_v20 = vld [vmem:[#allocation18_spill] sm:$0xff]  ;;  %v3995_v23 = vsub.f32 %v2364_v63, %v2364_v63  ;;  %v4914_v63 = vmov 0.0   ;;  %v4926_v16 = vand.u32 4294901760, %v3869_v58 }
  0x8e   : > { %2656 = vmatpush3.msra.mxu0 %v4895_v39  ;;  %2685 = vmatpush3.msra.mxu1 %v4848_v21  ;;  %v2381_v39 = vsel %vm4771_vm0, 1.0, %v4731_v61  ;;  %v3910_v21 = vsub.f32 %v3799_v14, %v4721_v55  ;;  %v3929_v55 = vsub.f32 %v3812_v59, %v4726_v2  ;;  %v4906_v2 = vld [vmem:[#allocation16_spill] sm:$0xff]  ;;  %v3969_v41 = vsub.f32 %v3824_v28, %v4729_v38 }
  0x8f   : > { %2657 = vmatprep.subr.mxu0 %v4897_v32  ;;  %2686 = vmatprep.subr.mxu1 %v4900_v3  ;;  %v4901_v32 = vld [vmem:[#allocation23_spill] sm:$0xff]  ;;  %v2365_v3 = vsel %vm4772_vm1, 1.0, %v4731_v61 }
  0x90   : > { %2658 = vmatpush3.msra.mxu0 %v4899_v22  ;;  %v3921_v22 = vsub.f32 %v2366_v24, %v2366_v24  ;;  %2687 = vmatpush3.msra.mxu1 %v4905_v34  ;;  %v3950_v34 = vsub.f32 %v2381_v39, %v2381_v39  ;;  %v2380_v24 = vsel %vm4773_vm15, 1.0, %v4731_v61  ;;  %v3964_v39 = vsub.f32 %v2365_v3, %v2365_v3 }
  0x91   : > { %1242 = vmatmul.mubr.f32.vlgmr.msra.gmra.mxu0 %v4901_v32  ;;  %2697 = vmatprep.subr.msk.mxu0 %vm4725_vm2, %v4735_v11  ;;  %vm397_vm2 = vcmp.gt.f32.partialorder %v3902_v48, 0.5  ;;  %v4931_v0 = vand.u32 4294901760, %v3929_v55  ;;  %v4933_v55 = vand.u32 4294901760, %v3995_v23 }
  0x92   : > { %4903 = vst [vmem:[#allocation2_spill] sm:$0xff] %v3921_v22  ;;  %2698 = vmatpush3.msk.msra.mxu0 %vm4792_vm3, %v4735_v11  ;;  %2688 = vmatprep.subr.mxu1 %v4906_v2  ;;  %4907 = vst [vmem:[#allocation9_spill] sm:$0xff] %v3950_v34  ;;  %v2379_v38 = vsel %vm397_vm2, 1.0, %v4731_v61  ;;  %v3999_v61 = vld [vmem:[%s3061_s7 + $0xa0] sm:$0xff]  ;;  %v4919_v10 = vand.u32 4294901760, %v3921_v22  ;;  %v4923_v8 = vand.u32 4294901760, %v3964_v39 }
  0x93   : > { %2699 = vmatprep.subr.msk.mxu0 %vm4728_vm4, %v4735_v11  ;;  %2689 = vmatpush3.msra.mxu1 %v4908_v20  ;;  %vm381_vm4 = vcmp.gt.f32.partialorder %v3932_v13, 0.5  ;;  %v3976_v20 = vld [vmem:[%s3061_s7 + $0x28] sm:$0xff]  ;;  %4912 = vst [vmem:[#allocation16_spill] sm:$0xff] %v3999_v61  ;;  %v4002_v2 = vld [vmem:[%s3061_s7 + $0x20] sm:$0xff]  ;;  %v4021_v3 = vsub.f32 %v2379_v38, %v2379_v38  ;;  %v4917_v38 = vand.u32 4294901760, %v3919_v29 }
  0x94   : > { %2700 = vmatpush3.msk.msra.mxu0 %vm4742_vm5, %v4735_v11  ;;  %4910 = vst [vmem:[#allocation14_spill] sm:$0xff] %v3976_v20  ;;  %2690 = vmatprep.subr.mxu1 %v4911_v1  ;;  %v3992_v1 = vsub.f32 %v2380_v24, %v2380_v24  ;;  %v2363_v27 = vsel %vm381_vm4, 1.0, %v4914_v63  ;;  %vm379_vm5 = vcmp.gt.f32.partialorder %v4002_v2, 0.5  ;;  %v4093_v53 = vsub.f32 %v3964_v39, %v4923_v8  ;;  %v4110_v8 = vld [vmem:[%s3061_s7 + $0x10] sm:$0xff] }
  0x95   : > { %2701 = vmatprep.subr.msk.mxu0 %vm4734_vm6, %v4735_v11  ;;  %2691 = vmatpush3.msra.mxu1 %v3412_v9  ;;  %v4913_v9 = vand.u32 4294901760, %v3861_v31  ;;  %vm380_vm6 = vcmp.gt.f32.partialorder %v3976_v20, 0.5  ;;  %v4043_v26 = vsub.f32 %v3919_v29, %v4917_v38  ;;  %v4052_v19 = vsub.f32 %v2363_v27, %v2363_v27 }
  0x96   : > { %2702 = vmatpush3.msk.msra.mxu0 %vm4733_vm7, %v4735_v11  ;;  %2692 = vmatprep.subr.mxu1 %v3427_v43  ;;  %vm396_vm7 = vcmp.gt.f32.partialorder %v3973_v51, 0.5  ;;  %v2362_v38 = vsel %vm380_vm6, 1.0, %v4914_v63  ;;  %v4063_v29 = vsub.f32 %v3921_v22, %v4919_v10  ;;  %v4920_v27 = vand.u32 4294901760, %v3804_v46 }
  0x97   : > { %2703 = vmatprep.subr.msk.mxu0 %vm4741_vm8, %v4735_v11  ;;  %v4011_v24 = vsub.f32 %v3861_v31, %v4913_v9  ;;  %2693 = vmatpush3.msra.mxu1 %v4856_v40  ;;  %v4026_v11 = vld [vmem:[%s3061_s7 + $0x98] sm:$0xff]  ;;  %v4916_v40 = vand.u32 4294901760, %v3895_v42  ;;  %vm395_vm8 = vcmp.gt.f32.partialorder %v3999_v61, 0.5  ;;  %v4918_v9 = vand.u32 4294901760, %v3779_v6 }
  0x98   : > { %1344 = vmatprep.mubr.f32.mxu1 %v4896_v44  ;;  %2704 = vmatpush3.msk.msra.mxu0 %vm4750_vm9, %v4915_v45  ;;  %vm378_vm9 = vcmp.gt.f32.partialorder %v4029_v36, 0.5  ;;  %v4921_v10 = vand.u32 4294901760, %v3838_v30  ;;  %v2377_v46 = vsel %vm395_vm8, 1.0, %v4914_v63  ;;  %v4096_v30 = vld [vmem:[%s3061_s7 + $0x90] sm:$0xff]  ;;  %v4107_v22 = vsub.f32 %v2362_v38, %v2362_v38  ;;  %v4126_v38 = vld [vmem:[%s3061_s7 + $0x88] sm:$0xff] }
  0x99   : > { %1346 = vmatmul.mubr.f32.vlgmr.msra.gmra.mxu1 %v4901_v32  ;;  %v4038_v43 = vsub.f32 %v3895_v42, %v4916_v40  ;;  %2705 = vmatprep.subr.msk.mxu0 %vm4749_vm10, %v4915_v45  ;;  %v2378_v40 = vsel %vm396_vm7, 1.0, %v4914_v63  ;;  %v1619_v6 = vand.u32 4294901760, %v4011_v24  ;;  %vm394_vm10 = vcmp.gt.f32.partialorder %v4026_v11, 0.5 }
  0x9a   : > { %2732 = vmatprep.subr.mxu1 %v4918_v9  ;;  %2706 = vmatpush3.msk.msra.mxu0 %vm386_vm11, %v4915_v45  ;;  %v4922_v24 = vand.u32 4294901760, %v3950_v34  ;;  %v2361_v9 = vsel %vm379_vm5, 1.0, %v4914_v63  ;;  %v4104_v50 = vsub.f32 %v2378_v40, %v2378_v40  ;;  %v4133_v58 = vsub.f32 %v2377_v46, %v2377_v46  ;;  %v4144_v40 = vld [vmem:[%s3061_s7 + $0x8] sm:$0xff] }
  0x9b   : > { %2733 = vmatpush3.msra.mxu1 %v4920_v27  ;;  %2707 = vmatprep.subr.msk.mxu0 %vm4761_vm12, %v4915_v45  ;;  %vm4925_vm12 = vcmp.gt.f32.partialorder %v3794_v12, 0.5  ;;  %v1521_v46 = vand.u32 4294901760, %v4093_v53  ;;  %v4170_v53 = vld [vmem:[%s3061_s7] sm:$0xff] }
  0x9c   : > { %2734 = vmatprep.subr.mxu1 %v4921_v10  ;;  %v4085_v27 = vsub.f32 %v3950_v34, %v4922_v24  ;;  %2708 = vmatpush3.msk.msra.mxu0 %vm4766_vm13, %v4915_v45  ;;  %v4924_v10 = vand.u32 4294901760, %v3843_v37  ;;  %v1507_v24 = vand.u32 4294901760, %v4038_v43  ;;  %v1626_v34 = vand.u32 4294901760, %v4043_v26 }
  0x9d   : > { %2709 = vmatprep.subr.msk.mxu0 %vm4925_vm12, %v4915_v45  ;;  %v1514_v37 = vand.u32 4294901760, %v4063_v29  ;;  %v2376_v43 = vsel %vm394_vm10, 1.0, %v4914_v63  ;;  %v2360_v26 = vsel %vm378_vm9, 1.0, %v4914_v63  ;;  %vm4927_vm12 = vcmp.gt.f32.partialorder %v3807_v60, 0.5  ;;  %1692 = vmatprep.mubr.f32.mxu1 %v4896_v44 }
  0x9e   : > { %2735 = vmatpush3.msra.mxu1 %v4924_v10  ;;  %2710 = vmatpush3.msk.msra.mxu0 %vm4927_vm12, %v4915_v45  ;;  %v4135_v29 = vsub.f32 %v2361_v9, %v2361_v9  ;;  %v4929_v10 = vand.u32 4294901760, %v3992_v1  ;;  %vm393_vm13 = vcmp.gt.f32.partialorder %v4096_v30, 0.5  ;;  %v1633_v9 = vand.u32 4294901760, %v4085_v27 }
  0x9f   : > { %2736 = vmatprep.subr.mxu1 %v4926_v16  ;;  %v4928_v16 = vand.u32 4294901760, %v3887_v49  ;;  %2711 = vmatprep.subr.msk.mxu0 %vm4771_vm0, %v4915_v45  ;;  %v4930_v49 = vand.u32 4294901760, %v3910_v21  ;;  %vm377_vm12 = vcmp.gt.f32.partialorder %v4110_v8, 0.5  ;;  %v4163_v60 = vsub.f32 %v2376_v43, %v2376_v43 }
  0xa0   : > { %v4140_v12 = vsub.f32 %v3992_v1, %v4929_v10  ;;  %v4156_v10 = vld [vmem:[%s3061_s7 + $0x80] sm:$0xff]  ;;  %2712 = vmatpush3.msk.msra.mxu0 %vm4772_vm1, %v4915_v45  ;;  %v4165_v21 = vsub.f32 %v2360_v26, %v2360_v26  ;;  %vm392_vm0 = vcmp.gt.f32.partialorder %v4126_v38, 0.5  ;;  %v2375_v43 = vsel %vm393_vm13, 1.0, %v4914_v63 }
  0xa1   : > { %2737 = vmatpush3.msra.mxu1 %v4928_v16  ;;  %v4775_v16 = vand.u32 4294901760, %v4021_v3  ;;  %2713 = vmatprep.subr.msk.mxu0 %vm4773_vm15, %v4915_v45  ;;  %vm4791_vm1 = vcmp.gt.f32.partialorder %v4144_v40, 0.5  ;;  %v4934_v27 = vand.u32 4294901760, %v3969_v41  ;;  %vm4790_vm15 = vcmp.gt.f32.partialorder %v4156_v10, 0.5 }
  0xa2   : > { %2738 = vmatprep.subr.mxu1 %v4930_v49  ;;  %v4932_v49 = vand.u32 4294901760, %v3943_v56  ;;  %2714 = vmatpush3.msk.msra.mxu0 %vm4774_vm14, %v4915_v45  ;;  %v1640_v56 = vand.u32 4294901760, %v4140_v12  ;;  %v2374_v12 = vsel %vm392_vm0, 1.0, %v4914_v63  ;;  %vm4789_vm14 = vcmp.gt.f32.partialorder %v4170_v53, 0.5 }
  0xa3   : > { %2739 = vmatpush3.msra.mxu1 %v4931_v0  ;;  %v1527_v0 = vsub.f32 %v3995_v23, %v4933_v55  ;;  %2715 = vmatprep.subr.msk.mxu0 %vm397_vm2, %v4915_v45  ;;  %v1646_v41 = vsub.f32 %v4021_v3, %v4775_v16  ;;  %v4210_v55 = vsub.f32 %v2375_v43, %v2375_v43  ;;  %v2358_v16 = vsel %vm4791_vm1, 1.0, %v4914_v63 }
  0xa4   : > { %2740 = vmatprep.subr.mxu1 %v4932_v49  ;;  %v2359_v49 = vsel %vm377_vm12, 1.0, %v4914_v63  ;;  %2716 = vmatpush3.msk.msra.mxu0 %vm381_vm4, %v4915_v45  ;;  %v4234_v51 = vsub.f32 %v2374_v12, %v2374_v12  ;;  %v4245_v20 = vsub.f32 %v2358_v16, %v2358_v16  ;;  %v4941_v61 = vand.u32 4294901760, %v4135_v29 }
  0xa5   : > { %2741 = vmatpush3.msra.mxu1 %v4934_v27  ;;  %2717 = vmatprep.subr.msk.mxu0 %vm396_vm7, %v4915_v45  ;;  %v4222_v27 = vsub.f32 %v2359_v49, %v2359_v49  ;;  %v1528_v48 = vand.u32 4294901760, %v1527_v0  ;;  %v1647_v13 = vand.u32 4294901760, %v1646_v41  ;;  %v4787_v16 = vand.u32 4294901760, %v4210_v55 }
  0xa6   : > { %2742 = vmatprep.subr.mxu1 %v1619_v6  ;;  %v4935_v6 = vand.u32 4294901760, %v4052_v19  ;;  %2718 = vmatpush3.msk.msra.mxu0 %vm380_vm6, %v4915_v45  ;;  %v4943_v12 = vand.u32 4294901760, %v4163_v60 }
  0xa7   : > { %2743 = vmatpush3.msra.mxu1 %v1507_v24  ;;  %4936 = vst [vmem:[#allocation18_spill] sm:$0xff] %v4222_v27  ;;  %v4937_v24 = vand.u32 4294901760, %v4104_v50  ;;  %2719 = vmatprep.subr.msk.mxu0 %vm395_vm8, %v4915_v45 }
  0xa8   : > { %v1534_v26 = vsub.f32 %v4052_v19, %v4935_v6  ;;  %2744 = vmatprep.subr.mxu1 %v1626_v34  ;;  %v2373_v6 = vsel %vm4790_vm15, 1.0, %v4914_v63  ;;  %v4938_v34 = vand.u32 4294901760, %v4107_v22  ;;  %2720 = vmatpush3.msk.msra.mxu0 %vm379_vm5, %v4915_v45 }
  0xa9   : > { %v1653_v43 = vsub.f32 %v4104_v50, %v4937_v24  ;;  %2745 = vmatpush3.msra.mxu1 %v1514_v37  ;;  %v2357_v24 = vsel %vm4789_vm14, 1.0, %v4914_v63  ;;  %v4939_v37 = vand.u32 4294901760, %v4133_v58  ;;  %2721 = vmatprep.subr.msk.mxu0 %vm394_vm10, %v4915_v45 }
  0xaa   : > { %v1541_v49 = vsub.f32 %v4107_v22, %v4938_v34  ;;  %2746 = vmatprep.subr.mxu1 %v1633_v9  ;;  %v1535_v63 = vand.u32 4294901760, %v1534_v26  ;;  %v4254_v34 = vsub.f32 %v2373_v6, %v2373_v6  ;;  %v1548_v9 = vsub.f32 %v4135_v29, %v4941_v61  ;;  %2722 = vmatpush3.msk.msra.mxu0 %vm378_vm9, %v4915_v45 }
  0xab   : > { %v1660_v0 = vsub.f32 %v4133_v58, %v4939_v37  ;;  %2747 = vmatpush3.msra.mxu1 %v1521_v46  ;;  %v1654_v41 = vand.u32 4294901760, %v1653_v43  ;;  %v4263_v37 = vsub.f32 %v2357_v24, %v2357_v24  ;;  %v1667_v46 = vsub.f32 %v4163_v60, %v4943_v12  ;;  %2723 = vmatprep.subr.msk.mxu0 %vm393_vm13, %v4915_v45 }
  0xac   : > { %4940 = vst [vmem:[#allocation20_spill] sm:$0xff] %v4254_v34  ;;  %2748 = vmatprep.subr.mxu1 %v1640_v56  ;;  %v4786_v26 = vand.u32 4294901760, %v4222_v27  ;;  %v1542_v61 = vand.u32 4294901760, %v1541_v49  ;;  %v4944_v43 = vand.u32 4294901760, %v4165_v21  ;;  %v4788_v12 = vand.u32 4294901760, %v4245_v20  ;;  %2724 = vmatpush3.msk.msra.mxu0 %vm377_vm12, %v4915_v45 }
  0xad   : > { %4942 = vst [vmem:[#allocation31_spill] sm:$0xff] %v4263_v37  ;;  %2749 = vmatpush3.msra.mxu1 %v1528_v48  ;;  %v1661_v56 = vand.u32 4294901760, %v1660_v0  ;;  %v1549_v48 = vand.u32 4294901760, %v1548_v9  ;;  %v1674_v49 = vsub.f32 %v4210_v55, %v4787_v16  ;;  %v4794_v6 = vand.u32 4294901760, %v4254_v34  ;;  %2725 = vmatprep.subr.msk.mxu0 %vm392_vm0, %v4915_v45 }
  0xae   : > { %2750 = vmatprep.subr.mxu1 %v1647_v13  ;;  %v1555_v24 = vsub.f32 %v4165_v21, %v4944_v43  ;;  %v1668_v13 = vand.u32 4294901760, %v1667_v46  ;;  %v1562_v0 = vsub.f32 %v4222_v27, %v4786_v26  ;;  %v4793_v43 = vand.u32 4294901760, %v4263_v37  ;;  %2726 = vmatpush3.msk.msra.mxu0 %vm4791_vm1, %v4915_v45  ;;  %v4946_v26 = vld [vmem:[#allocation30_spill] sm:$0xff] }
  0xaf   : > { %2751 = vmatpush3.msra.mxu1 %v1535_v63  ;;  %v4945_v63 = vand.u32 4294901760, %v4234_v51  ;;  %2727 = vmatprep.subr.msk.mxu0 %vm4790_vm15, %v4915_v45  ;;  %v1569_v46 = vsub.f32 %v4245_v20, %v4788_v12  ;;  %vm4949_vm15 = vcmp.gt.f32.partialorder %v3661_v62, 0.5  ;;  %vm4950_vm1 = vcmp.gt.f32.partialorder %v3668_v4, 0.5 }
  0xb0   : > { %2752 = vmatprep.subr.mxu1 %v1654_v41  ;;  %v1556_v41 = vand.u32 4294901760, %v1555_v24  ;;  %2728 = vmatpush3.msk.msra.mxu0 %vm4789_vm14, %v4915_v45  ;;  %v1563_v16 = vand.u32 4294901760, %v1562_v0  ;;  %v4947_v24 = vld [vmem:[#allocation29_spill] sm:$0xff]  ;;  %vm4948_vm14 = vcmp.gt.f32.partialorder %v3642_v25, 0.5  ;;  %v4955_v0 = vld [vmem:[#allocation15_spill] sm:$0xff] }
  0xb1   : > { %2753 = vmatpush3.msra.mxu1 %v1542_v61  ;;  %v1681_v9 = vsub.f32 %v4234_v51, %v4945_v63  ;;  %v1675_v61 = vand.u32 4294901760, %v1674_v49  ;;  %v1688_v63 = vsub.f32 %v4254_v34, %v4794_v6  ;;  %1456 = vmatprep.mubr.f32.mxu0 %v4946_v26  ;;  %v4983_v6 = vld [vmem:[#allocation26_spill] sm:$0xff] }
  0xb2   : > { %2754 = vmatprep.subr.mxu1 %v1661_v56  ;;  %v1576_v56 = vsub.f32 %v4263_v37, %v4793_v43  ;;  %2767 = vmatprep.subr.mxu0 %v3696_v54 }
  0xb3   : > { %2755 = vmatpush3.msra.mxu1 %v1549_v48  ;;  %1462 = vmatmul.mubr.f32.vlgmr.msra.gmra.mxu0 %v4947_v24  ;;  %v1682_v12 = vand.u32 4294901760, %v1681_v9  ;;  %v1570_v48 = vand.u32 4294901760, %v1569_v46  ;;  %v1689_v49 = vand.u32 4294901760, %v1688_v63  ;;  %v4957_v9 = vld [vmem:[#allocation9_spill] sm:$0xff] }
  0xb4   : > { %2756 = vmatprep.subr.mxu1 %v1668_v13  ;;  %2768 = vmatpush3.msra.mxu0 %v3711_v18  ;;  %v1577_v26 = vand.u32 4294901760, %v1576_v56  ;;  %v4954_v13 = vld [vmem:[#allocation2_spill] sm:$0xff]  ;;  %v4960_v46 = vld [vmem:[#allocation17_spill] sm:$0xff] }
  0xb5   : > { %2757 = vmatpush3.msra.mxu1 %v1556_v41  ;;  %2769 = vmatprep.subr.mxu0 %v3732_v57  ;;  %v4958_v41 = vld [vmem:[#allocation4_spill] sm:$0xff]  ;;  %v4965_v56 = vld [vmem:[#allocation6_spill] sm:$0xff]  ;;  %v4967_v24 = vld [vmem:[#allocation21_spill] sm:$0xff] }
  0xb6   : > { %2758 = vmatprep.subr.mxu1 %v1675_v61  ;;  %2770 = vmatpush3.msra.mxu0 %v3742_v52  ;;  %v4962_v61 = vld [vmem:[#allocation5_spill] sm:$0xff] }
  0xb7   : > { %2759 = vmatpush3.msra.mxu1 %v1563_v16  ;;  %2771 = vmatprep.subr.mxu0 %v3760_v47  ;;  %v4951_v16 = vld [vmem:[#allocation12_spill] sm:$0xff] }
  0xb8   : > { %2760 = vmatprep.subr.mxu1 %v1682_v12  ;;  %2772 = vmatpush3.msra.mxu0 %v3768_v5  ;;  %v4952_v12 = vld [vmem:[#allocation3_spill] sm:$0xff] }
  0xb9   : > { %2761 = vmatpush3.msra.mxu1 %v1570_v48  ;;  %2773 = vmatprep.subr.mxu0 %v3799_v14  ;;  %v4969_v48 = vld [vmem:[#allocation7_spill] sm:$0xff] }
  0xba   : > { %2762 = vmatprep.subr.mxu1 %v1689_v49  ;;  %2774 = vmatpush3.msra.mxu0 %v3812_v59  ;;  %v4971_v49 = vld [vmem:[#allocation8_spill] sm:$0xff] }
  0xbb   : > { %2763 = vmatpush3.msra.mxu1 %v1577_v26  ;;  %2775 = vmatprep.subr.mxu0 %v3814_v15  ;;  %v4973_v26 = vld [vmem:[#allocation10_spill] sm:$0xff] }
  0xbc   : > { %1694 = vmatmul.mubr.f32.vlgmr.msra.gmra.mxu1 %v4901_v32  ;;  %2802 = vmatprep.subr.msk.mxu1 %vm4948_vm14, %v4915_v45  ;;  %vm4953_vm14 = vcmp.gt.f32.partialorder %v4952_v12, 0.5  ;;  %v4984_v32 = vld [vmem:[#allocation25_spill] sm:$0xff] }
  0xbd   : > { %2776 = vmatpush3.msra.mxu0 %v3824_v28  ;;  %2803 = vmatpush3.msk.msra.mxu1 %vm4792_vm3, %v4915_v45  ;;  %vm4956_vm3 = vcmp.gt.f32.partialorder %v4955_v0, 0.5 }
  0xbe   : > { %2777 = vmatprep.subr.mxu0 %v3861_v31  ;;  %2804 = vmatprep.subr.msk.mxu1 %vm4949_vm15, %v4915_v45  ;;  %vm4959_vm15 = vcmp.gt.f32.partialorder %v4958_v41, 0.5 }
  0xbf   : > { %2778 = vmatpush3.msra.mxu0 %v3895_v42  ;;  %2805 = vmatpush3.msk.msra.mxu1 %vm4950_vm1, %v4915_v45  ;;  %vm4961_vm1 = vcmp.gt.f32.partialorder %v4960_v46, 0.5 }
  0xc0   : > { %2779 = vmatprep.subr.mxu0 %v4951_v16  ;;  %2806 = vmatprep.subr.msk.mxu1 %vm4953_vm14, %v4915_v45  ;;  %vm4963_vm14 = vcmp.gt.f32.partialorder %v4962_v61, 0.5 }
  0xc1   : > { %2780 = vmatpush3.msra.mxu0 %v4954_v13  ;;  %2807 = vmatpush3.msk.msra.mxu1 %vm4956_vm3, %v4915_v45  ;;  %vm4966_vm3 = vcmp.gt.f32.partialorder %v4965_v56, 0.5 }
  0xc2   : > { %2781 = vmatprep.subr.mxu0 %v4957_v9  ;;  %2808 = vmatprep.subr.msk.mxu1 %vm4959_vm15, %v4915_v45  ;;  %vm4968_vm15 = vcmp.gt.f32.partialorder %v4967_v24, 0.5 }
  0xc3   : > { %2782 = vmatpush3.msra.mxu0 %v3964_v39  ;;  %2809 = vmatpush3.msk.msra.mxu1 %vm4961_vm1, %v4915_v45  ;;  %vm4970_vm1 = vcmp.gt.f32.partialorder %v4969_v48, 0.5 }
  0xc4   : > { %2783 = vmatprep.subr.mxu0 %v3992_v1  ;;  %2810 = vmatprep.subr.msk.mxu1 %vm4963_vm14, %v4915_v45  ;;  %vm4972_vm14 = vcmp.gt.f32.partialorder %v4971_v49, 0.5 }
  0xc5   : > { %2784 = vmatpush3.msra.mxu0 %v3995_v23  ;;  %2811 = vmatpush3.msk.msra.mxu1 %vm386_vm11, %v4915_v45 }
  0xc6   : > { %2785 = vmatprep.subr.mxu0 %v4021_v3  ;;  %2812 = vmatprep.subr.msk.mxu1 %vm4966_vm3, %v4915_v45  ;;  %vm4974_vm3 = vcmp.gt.f32.partialorder %v4973_v26, 0.5 }
  0xc7   : > { %2786 = vmatpush3.msra.mxu0 %v4052_v19  ;;  %2813 = vmatpush3.msk.msra.mxu1 %vm4968_vm15, %v4915_v45  ;;  %vm4975_vm15 = vcmp.gt.f32.partialorder %v3847_v7, 0.5 }
  0xc8   : > { %2787 = vmatprep.subr.mxu0 %v4104_v50  ;;  %2814 = vmatprep.subr.msk.mxu1 %vm4970_vm1, %v4915_v45  ;;  %vm4976_vm1 = vcmp.gt.f32.partialorder %v3873_v17, 0.5 }
  0xc9   : > { %2788 = vmatpush3.msra.mxu0 %v4107_v22  ;;  %2815 = vmatpush3.msk.msra.mxu1 %vm4972_vm14, %v4915_v45  ;;  %vm4977_vm14 = vcmp.gt.f32.partialorder %v3876_v35, 0.5 }
  0xca   : > { %2789 = vmatprep.subr.mxu0 %v4133_v58  ;;  %2816 = vmatprep.subr.msk.mxu1 %vm4974_vm3, %v4915_v45  ;;  %vm4990_vm3 = vcmp.gt.f32.partialorder %v4144_v40, 0.5 }
  0xcb   : > { %2790 = vmatpush3.msra.mxu0 %v4135_v29  ;;  %2817 = vmatpush3.msk.msra.mxu1 %vm4975_vm15, %v4915_v45  ;;  %vm4992_vm15 = vcmp.gt.f32.partialorder %v4156_v10, 0.5 }
  0xcc   : > { %2791 = vmatprep.subr.mxu0 %v4163_v60  ;;  %2818 = vmatprep.subr.msk.mxu1 %vm4976_vm1, %v4915_v45  ;;  %vm4994_vm1 = vcmp.gt.f32.partialorder %v4170_v53, 0.5 }
  0xcd   : > { %2792 = vmatpush3.msra.mxu0 %v4165_v21  ;;  %2819 = vmatpush3.msk.msra.mxu1 %vm4977_vm14, %v4915_v45  ;;  %vm4999_vm14 = vcmp.gt.f32.partialorder %v3642_v25, 0.5  ;;  %v5006_v25 = vand.u32 4294901760, %v4951_v16  ;;  %v5044_v16 = vld [vmem:[#allocation24_spill] sm:$0xff] }
  0xce   : > { %2793 = vmatprep.subr.mxu0 %v4210_v55  ;;  %2820 = vmatprep.subr.msk.mxu1 %vm397_vm2, %v4915_v45 }
  0xcf   : > { %2794 = vmatpush3.msra.mxu0 %v4222_v27  ;;  %2821 = vmatpush3.msk.msra.mxu1 %vm381_vm4, %v4915_v45 }
  0xd0   : > { %2795 = vmatprep.subr.mxu0 %v4234_v51  ;;  %2822 = vmatprep.subr.msk.mxu1 %vm396_vm7, %v4915_v45 }
  0xd1   : > { %2796 = vmatpush3.msra.mxu0 %v4245_v20  ;;  %2823 = vmatpush3.msk.msra.mxu1 %vm380_vm6, %v4915_v45 }
  0xd2   : > { %2797 = vmatprep.subr.mxu0 %v4254_v34  ;;  %2824 = vmatprep.subr.msk.mxu1 %vm395_vm8, %v4915_v45  ;;  %v4985_v34 = vand.u32 4294901760, %v3696_v54  ;;  %v4988_v54 = vand.u32 4294901760, %v3742_v52  ;;  %v4993_v52 = vand.u32 4294901760, %v3799_v14  ;;  %v5000_v14 = vand.u32 4294901760, %v3824_v28 }
  0xd3   : > { %2798 = vmatpush3.msra.mxu0 %v4263_v37  ;;  %1829 = vmatprep.mubr.f32.mxu0 %v4983_v6  ;;  %v4986_v37 = vand.u32 4294901760, %v3711_v18  ;;  %v4989_v18 = vand.u32 4294901760, %v3760_v47  ;;  %v4995_v47 = vld [vmem:[#allocation28_spill] sm:$0xff]  ;;  %v5002_v6 = vand.u32 4294901760, %v3861_v31  ;;  %v5016_v28 = vand.u32 4294901760, %v3995_v23 }
  0xd4   : > { %2825 = vmatpush3.msk.msra.mxu1 %vm379_vm5, %v4915_v45  ;;  %1832 = vmatmul.mubr.f32.vlgmr.msra.gmra.mxu0 %v4984_v32  ;;  %v4987_v32 = vand.u32 4294901760, %v3732_v57  ;;  %v4991_v57 = vand.u32 4294901760, %v3768_v5  ;;  %v4998_v5 = vand.u32 4294901760, %v3814_v15  ;;  %v5014_v15 = vand.u32 4294901760, %v3992_v1 }
  0xd5   : > { %2826 = vmatprep.subr.msk.mxu1 %vm394_vm10, %v4915_v45  ;;  %2837 = vmatprep.subr.mxu0 %v4985_v34  ;;  %v4996_v34 = vand.u32 4294901760, %v3812_v59  ;;  %v5004_v59 = vand.u32 4294901760, %v3895_v42  ;;  %v5017_v31 = vand.u32 4294901760, %v4021_v3  ;;  %v5019_v42 = vand.u32 4294901760, %v4052_v19 }
  0xd6   : > { %2827 = vmatpush3.msk.msra.mxu1 %vm378_vm9, %v4915_v45  ;;  %2838 = vmatpush3.msra.mxu0 %v4986_v37  ;;  %v4997_v37 = vld [vmem:[#allocation27_spill] sm:$0xff]  ;;  %v5021_v23 = vand.u32 4294901760, %v4104_v50  ;;  %v5025_v19 = vand.u32 4294901760, %v4133_v58  ;;  %v5027_v50 = vand.u32 4294901760, %v4135_v29  ;;  %v5031_v3 = vand.u32 4294901760, %v4165_v21  ;;  %v5040_v21 = vld [vmem:[#allocation20_spill] sm:$0xff] }
  0xd7   : > { %2828 = vmatprep.subr.msk.mxu1 %vm393_vm13, %v4915_v45  ;;  %2839 = vmatprep.subr.mxu0 %v4987_v32  ;;  %v5033_v1 = vand.u32 4294901760, %v4210_v55  ;;  %v5037_v58 = vand.u32 4294901760, %v4234_v51  ;;  %v5039_v29 = vand.u32 4294901760, %v4245_v20  ;;  %v5041_v55 = vand.u32 4294901760, %v5040_v21  ;;  %v5042_v51 = vld [vmem:[#allocation31_spill] sm:$0xff] }
  0xd8   : > { %2829 = vmatpush3.msk.msra.mxu1 %vm377_vm12, %v4915_v45  ;;  %2840 = vmatpush3.msra.mxu0 %v4988_v54  ;;  %v5043_v43 = vand.u32 4294901760, %v5042_v51  ;;  %v5045_v20 = vld [vmem:[#allocation23_spill] sm:$0xff] }
  0xd9   : > { %2830 = vmatprep.subr.msk.mxu1 %vm392_vm0, %v4915_v45  ;;  %2841 = vmatprep.subr.mxu0 %v4989_v18 }
  0xda   : > { %2831 = vmatpush3.msk.msra.mxu1 %vm4990_vm3, %v4915_v45  ;;  %2842 = vmatpush3.msra.mxu0 %v4991_v57  ;;  %vm5001_vm3 = vcmp.gt.f32.partialorder %v3651_v33, 0.5  ;;  %v5008_v33 = vand.u32 4294901760, %v4954_v13 }
  0xdb   : > { %2832 = vmatprep.subr.msk.mxu1 %vm4992_vm15, %v4915_v45  ;;  %2843 = vmatprep.subr.mxu0 %v4993_v52  ;;  %vm5003_vm15 = vcmp.gt.f32.partialorder %v3661_v62, 0.5  ;;  %v5010_v62 = vand.u32 4294901760, %v4957_v9 }
  0xdc   : > { %2833 = vmatpush3.msk.msra.mxu1 %vm4994_vm1, %v4915_v45  ;;  %1936 = vmatprep.mubr.f32.mxu1 %v4995_v47  ;;  %vm5005_vm1 = vcmp.gt.f32.partialorder %v3668_v4, 0.5  ;;  %v5012_v4 = vand.u32 4294901760, %v3964_v39  ;;  %v5023_v39 = vand.u32 4294901760, %v4107_v22  ;;  %v5029_v22 = vand.u32 4294901760, %v4163_v60  ;;  %v5034_v60 = vld [vmem:[#allocation18_spill] sm:$0xff] }
  0xdd   : > { %2844 = vmatpush3.msra.mxu0 %v4996_v34  ;;  %1940 = vmatmul.mubr.f32.vlgmr.msra.gmra.mxu1 %v4997_v37 }
  0xde   : > { %2845 = vmatprep.subr.mxu0 %v4998_v5  ;;  %2872 = vmatprep.subr.msk.mxu1 %vm4999_vm14, %v4915_v45  ;;  %vm5007_vm14 = vcmp.gt.f32.partialorder %v4952_v12, 0.5 }
  0xdf   : > { %2846 = vmatpush3.msra.mxu0 %v5000_v14  ;;  %2873 = vmatpush3.msk.msra.mxu1 %vm5001_vm3, %v4915_v45  ;;  %vm5009_vm3 = vcmp.gt.f32.partialorder %v4955_v0, 0.5 }
  0xe0   : > { %2847 = vmatprep.subr.mxu0 %v5002_v6  ;;  %2874 = vmatprep.subr.msk.mxu1 %vm5003_vm15, %v4915_v45  ;;  %vm5011_vm15 = vcmp.gt.f32.partialorder %v4958_v41, 0.5 }
  0xe1   : > { %2848 = vmatpush3.msra.mxu0 %v5004_v59  ;;  %2875 = vmatpush3.msk.msra.mxu1 %vm5005_vm1, %v4915_v45  ;;  %vm5013_vm1 = vcmp.gt.f32.partialorder %v4960_v46, 0.5 }
  0xe2   : > { %2849 = vmatprep.subr.mxu0 %v5006_v25  ;;  %2876 = vmatprep.subr.msk.mxu1 %vm5007_vm14, %v4915_v45  ;;  %vm5015_vm14 = vcmp.gt.f32.partialorder %v4962_v61, 0.5 }
  0xe3   : > { %2850 = vmatpush3.msra.mxu0 %v5008_v33  ;;  %2877 = vmatpush3.msk.msra.mxu1 %vm5009_vm3, %v4915_v45  ;;  %vm5018_vm3 = vcmp.gt.f32.partialorder %v4965_v56, 0.5 }
  0xe4   : > { %2851 = vmatprep.subr.mxu0 %v5010_v62  ;;  %2878 = vmatprep.subr.msk.mxu1 %vm5011_vm15, %v4915_v45  ;;  %vm5020_vm15 = vcmp.gt.f32.partialorder %v4967_v24, 0.5 }
  0xe5   : > { %2852 = vmatpush3.msra.mxu0 %v5012_v4  ;;  %2879 = vmatpush3.msk.msra.mxu1 %vm5013_vm1, %v4915_v45  ;;  %vm5024_vm1 = vcmp.gt.f32.partialorder %v4971_v49, 0.5 }
  0xe6   : > { %2853 = vmatprep.subr.mxu0 %v5014_v15  ;;  %2880 = vmatprep.subr.msk.mxu1 %vm5015_vm14, %v4915_v45  ;;  %vm5026_vm14 = vcmp.gt.f32.partialorder %v4973_v26, 0.5 }
  0xe7   : > { %2854 = vmatpush3.msra.mxu0 %v5016_v28  ;;  %2881 = vmatpush3.msk.msra.mxu1 %vm386_vm11, %v4915_v45  ;;  %vm5022_vm11 = vcmp.gt.f32.partialorder %v4969_v48, 0.5  ;;  %v488_v48 = vld [vmem:[%s3070_s13] sm:$0xff] }
  0xe8   : > { %2855 = vmatprep.subr.mxu0 %v5017_v31  ;;  %2882 = vmatprep.subr.msk.mxu1 %vm5018_vm3, %v4915_v45  ;;  %vm5028_vm3 = vcmp.gt.f32.partialorder %v3847_v7, 0.5  ;;  %v5035_v7 = vand.u32 4294901760, %v5034_v60 }
  0xe9   : > { %2856 = vmatpush3.msra.mxu0 %v5019_v42  ;;  %2883 = vmatpush3.msk.msra.mxu1 %vm5020_vm15, %v4915_v45  ;;  %vm5030_vm15 = vcmp.gt.f32.partialorder %v3873_v17, 0.5 }
  0xea   : > { %2857 = vmatprep.subr.mxu0 %v5021_v23  ;;  %2884 = vmatprep.subr.msk.mxu1 %vm5022_vm11, %v4915_v45  ;;  %vm5032_vm11 = vcmp.gt.f32.partialorder %v3876_v35, 0.5 }
  0xeb   : > { %2858 = vmatpush3.msra.mxu0 %v5023_v39  ;;  %2885 = vmatpush3.msk.msra.mxu1 %vm5024_vm1, %v4915_v45 }
  0xec   : > { %2859 = vmatprep.subr.mxu0 %v5025_v19  ;;  %2886 = vmatprep.subr.msk.mxu1 %vm5026_vm14, %v4915_v45  ;;  %v1354_v19 = vld [vmem:[%s3075_s22] sm:$0xff] }
  0xed   : > { %2860 = vmatpush3.msra.mxu0 %v5027_v50  ;;  %2887 = vmatpush3.msk.msra.mxu1 %vm5028_vm3, %v4915_v45 }
  0xee   : > { %2861 = vmatprep.subr.mxu0 %v5029_v22  ;;  %2888 = vmatprep.subr.msk.mxu1 %vm5030_vm15, %v4915_v45 }
  0xef   : > { %2862 = vmatpush3.msra.mxu0 %v5031_v3  ;;  %2889 = vmatpush3.msk.msra.mxu1 %vm5032_vm11, %v4915_v45 }
  0xf0   : > { %2863 = vmatprep.subr.mxu0 %v5033_v1  ;;  %2890 = vmatprep.subr.msk.mxu1 %vm397_vm2, %v4915_v45  ;;  %vm5046_vm2 = vcmp.gt.f32.partialorder %v4144_v40, 0.5 }
  0xf1   : > { %2864 = vmatpush3.msra.mxu0 %v5035_v7  ;;  %2891 = vmatpush3.msk.msra.mxu1 %vm381_vm4, %v4915_v45  ;;  %vm5047_vm4 = vcmp.gt.f32.partialorder %v4156_v10, 0.5 }
  0xf2   : > { %2865 = vmatprep.subr.mxu0 %v5037_v58  ;;  %2892 = vmatprep.subr.msk.mxu1 %vm396_vm7, %v4915_v45 }
  0xf3   : > { %2866 = vmatpush3.msra.mxu0 %v5039_v29  ;;  %2893 = vmatpush3.msk.msra.mxu1 %vm380_vm6, %v4915_v45  ;;  %vm1352_vm6 = vcmask 130048  }
  0xf4   : > { %2867 = vmatprep.subr.mxu0 %v5041_v55  ;;  %2894 = vmatprep.subr.msk.mxu1 %vm395_vm8, %v4915_v45 }
  0xf5   : > { %2868 = vmatpush3.msra.mxu0 %v5043_v43  ;;  %2106 = vmatprep.mubr.f32.mxu0 %v5044_v16 }
  0xf6   : > { %2895 = vmatpush3.msk.msra.mxu1 %vm379_vm5, %v4915_v45  ;;  %2108 = vmatmul.mubr.f32.vlgmr.msra.gmra.mxu0 %v5045_v20  ;;  %vm5048_vm5 = vcmp.gt.f32.partialorder %v4170_v53, 0.5 }
  0xf7   : > { %2896 = vmatprep.subr.msk.mxu1 %vm394_vm10, %v4915_v45  ;;  %2210 = vmatprep.mubr.f32.mxu1 %v5044_v16 }
  0xf8   : > { %2897 = vmatpush3.msk.msra.mxu1 %vm378_vm9, %v4915_v45 }
  0xf9   : > { %2898 = vmatprep.subr.msk.mxu1 %vm393_vm13, %v4915_v45 }
  0xfa   : > { %2899 = vmatpush3.msk.msra.mxu1 %vm377_vm12, %v4915_v45 }
  0xfb   : > { %2900 = vmatprep.subr.msk.mxu1 %vm392_vm0, %v4915_v45 }
  0xfc   : > { %2901 = vmatpush3.msk.msra.mxu1 %vm5046_vm2, %v4915_v45 }
  0xfd   : > { %2902 = vmatprep.subr.msk.mxu1 %vm5047_vm4, %v4915_v45 }
  0xfe   : > { %2903 = vmatpush3.msk.msra.mxu1 %vm5048_vm5, %v4915_v45 }
  0xff   : > { %2212 = vmatmul.mubr.f32.vlgmr.msra.gmra.mxu1 %v5045_v20 }
 0x111   : > { %v2519_v36 = vpop.f32.mrf.mxu0  ;;  %v2554_v44 = vpop.f32.mrf.mxu1 }
 0x113   : > { %v2520_v11 = vpop.f32.mrf.mxu0  ;;  %v2555_v30 = vpop.f32.mrf.mxu1 }
 0x114   : > { %v2556_v27 = vadd.f32 %v2555_v30, %v2554_v44  ;;  %v2521_v13 = vadd.f32 %v2520_v11, %v2519_v36 }
 0x116   : > { %v830_v9 = vadd.f32 %v2556_v27, %v2521_v13 }
 0x131   : > { %v2589_v2 = vpop.f32.mrf.mxu0 }
 0x133   : > { %v2590_v8 = vpop.f32.mrf.mxu0 }
 0x134   : > { %v2591_v10 = vadd.f32 %v2590_v8, %v2589_v2 }
 0x135   : > { %v2624_v38 = vpop.f32.mrf.mxu1 }
 0x136   : > { %v968_v45 = vadd.f32 %v2591_v10, %v830_v9 }
 0x137   : > { %v2625_v12 = vpop.f32.mrf.mxu1 }
 0x138   : > { %v2626_v53 = vadd.f32 %v2625_v12, %v2624_v38 }
 0x13a   : > { %v1076_v61 = vadd.f32 %v2626_v53, %v968_v45 }
 0x151   : > { %v2659_v40 = vpop.f32.mrf.mxu0 }
 0x153   : > { %v2660_v0 = vpop.f32.mrf.mxu0 }
 0x154   : > { %v2661_v41 = vadd.f32 %v2660_v0, %v2659_v40 }
 0x156   : > { %v1244_v56 = vadd.f32 %v2661_v41, %v1076_v61 }
 0x159   : > { %v2694_v46 = vpop.f32.mrf.mxu1 }
 0x15b   : > { %v2695_v63 = vpop.f32.mrf.mxu1 }
 0x15c   : > { %v2696_v24 = vadd.f32 %v2695_v63, %v2694_v46 }
 0x15e   : > { %v1348_v49 = vadd.f32 %v2696_v24, %v1244_v56 }
 0x160   : > { %v1351_v26 = vadd.f32 %v1348_v49, %v488_v48 }
 0x162   : > { %1353 = vst.msk [vmem:[%s3070_s13] sm:$0xff] %vm1352_vm6, %v1351_v26 }
 0x173   : > { %v2729_v32 = vpop.f32.mrf.mxu0 }
 0x175   : > { %v2730_v54 = vpop.f32.mrf.mxu0 }
 0x176   : > { %v2731_v6 = vadd.f32 %v2730_v54, %v2729_v32 }
 0x17c   : > { %v2764_v18 = vpop.f32.mrf.mxu1 }
 0x17e   : > { %v2765_v52 = vpop.f32.mrf.mxu1 }
 0x17f   : > { %v2766_v5 = vadd.f32 %v2765_v52, %v2764_v18 }
 0x181   : > { %v1696_v33 = vadd.f32 %v2766_v5, %v2731_v6 }
 0x194   : > { %v2799_v57 = vpop.f32.mrf.mxu0 }
 0x196   : > { %v2800_v47 = vpop.f32.mrf.mxu0 }
 0x197   : > { %v2801_v59 = vadd.f32 %v2800_v47, %v2799_v57 }
 0x199   : > { %v1834_v4 = vadd.f32 %v2801_v59, %v1696_v33 }
 0x19d   : > { %v2834_v34 = vpop.f32.mrf.mxu1 }
 0x19f   : > { %v2835_v14 = vpop.f32.mrf.mxu1 }
 0x1a0   : > { %v2836_v62 = vadd.f32 %v2835_v14, %v2834_v34 }
 0x1a2   : > { %v1942_v31 = vadd.f32 %v2836_v62, %v1834_v4 }
 0x1b6   : > { %v2869_v37 = vpop.f32.mrf.mxu0 }
 0x1b8   : > { %v2870_v25 = vpop.f32.mrf.mxu0 }
 0x1b9   : > { %v2871_v15 = vadd.f32 %v2870_v25, %v2869_v37 }
 0x1bb   : > { %v2110_v23 = vadd.f32 %v2871_v15, %v1942_v31 }
 0x1bf   : > { %v2904_v28 = vpop.f32.mrf.mxu1 }
 0x1c1   : > { %v2905_v42 = vpop.f32.mrf.mxu1 }
 0x1c2   : > { %v2906_v39 = vadd.f32 %v2905_v42, %v2904_v28 }
 0x1c4   : > { %v2214_v50 = vadd.f32 %v2906_v39, %v2110_v23 }
 0x1c6   : > { %v2217_v22 = vadd.f32 %v2214_v50, %v1354_v19 }
 0x1c8   : > { %2218 = vst.msk [vmem:[%s3075_s22] sm:$0xff] %vm1352_vm6, %v2217_v22 }
 0x1c9 PF: > { %s15_s19 = sadd.s32 1, %s2988_s19   ;;  %s5049_s15 = smov %s2980_s17 }
 0x1ca   : > { %p12_p9 = scmp.ge.s32.totalorder %s15_s19, 6   ;;  %s5050_s16 = smov %s2984_s18 }
 0x1cb   : > { %s5051_s17 = smov %s5054_s20  ;;  %s5052_s18 = smov %s5058_s21 }
 0x1cc   :  { %14 = sbr.rel (!%p12_p9) target bundleno = 3 (0x3), region = 84 }

</bundles_post_ra>
